<compile_context>
chip_gen: v7x
topology: tpu7x:2x2x1
jax: 0.10.0
libtpu: 0.0.40
codegen_flags: <defaults>
</compile_context>

<pallas_src>
import functools

import jax
import jax.numpy as jnp
from jax.experimental import pallas as pl
from jax.experimental.pallas import tpu as pltpu


def _round_up(x, m):
    return (x + m - 1) // m * m


# ----------------------------------------------------------------------------
# Fused kernel: student lm_head + teacher lm_head + KD(KL) + causal-LM CE,
# tiled over (row tiles, vocab tiles) with online-softmax accumulation over V.
# ----------------------------------------------------------------------------
def _fused_kd_kernel(s_hid_ref, t_hid_ref, s_head_ref, t_head_ref,
                     label_ref, mask_ref,
                     logits_ref, kd_ref, ce_ref,
                     acc_ref, m_s_ref, m_t_ref, z_u_ref, z_w_ref, z_c_ref,
                     a_ref, tgt_ref,
                     *, temperature, inv_batch, col_tile, vocab_real, mask_cols):
    i = pl.program_id(0)          # row-tile index (outer)
    j = pl.program_id(1)          # vocab-tile index (inner, carries online softmax)
    nv = pl.num_programs(1)

    @pl.when((i == 0) & (j == 0))
    def _init_scalars():
        acc_ref[0] = 0.0          # running KL sum
        acc_ref[1] = 0.0          # running CE sum
        acc_ref[2] = 0.0          # running valid-token count

    @pl.when(j == 0)
    def _init_row_state():
        neg_inf = jnp.full(m_s_ref.shape, -jnp.inf, jnp.float32)
        m_s_ref[...] = neg_inf                      # running max of student logits
        m_t_ref[...] = neg_inf                      # running max of teacher logits
        z_u_ref[...] = jnp.zeros(z_u_ref.shape, jnp.float32)   # sum exp(t/T - m_t/T)
        z_w_ref[...] = jnp.zeros(z_w_ref.shape, jnp.float32)   # sum exp(s/T - m_s/T)
        z_c_ref[...] = jnp.zeros(z_c_ref.shape, jnp.float32)   # sum exp(s   - m_s)
        a_ref[...] = jnp.zeros(a_ref.shape, jnp.float32)       # sum exp(u-m_u)*(u-w)
        tgt_ref[...] = jnp.zeros(tgt_ref.shape, jnp.float32)   # target logit

    inv_t = 1.0 / temperature     # compile-time constant -> single vmul

    # ---- student lm_head tile: bf16 MXU inputs, f32 accumulation ------------
    s_logits = jnp.dot(s_hid_ref[...], s_head_ref[...],
                       preferred_element_type=jnp.float32)
    logits_ref[...] = s_logits.astype(logits_ref.dtype)   # lane-dense store, once

    col = jax.lax.broadcasted_iota(jnp.int32, s_logits.shape, 1) + j * col_tile
    if mask_cols:
        lane_ok = col < vocab_real
        s_use = jnp.where(lane_ok, s_logits, -jnp.inf)
    else:
        s_use = s_logits

    # ---- CE target-logit extraction (no (N, V) one-hot materialized) --------
    labels = label_ref[...]                               # (tm, 1) int32
    tgt_ref[...] += jnp.sum(jnp.where(col == labels, s_logits, 0.0),
                            axis=-1, keepdims=True)

    # ---- student online softmax state; single max shared by CE and KD -------
    m_s_old = m_s_ref[...]
    m_s_new = jnp.maximum(m_s_old, jnp.max(s_use, axis=-1, keepdims=True))
    e_c = jnp.exp(s_use - m_s_new)                        # T = 1 path (CE)
    e_w = jnp.exp((s_use - m_s_new) * inv_t)              # /T  path (KD)
    z_c_ref[...] = (z_c_ref[...] * jnp.exp(m_s_old - m_s_new)
                    + jnp.sum(e_c, axis=-1, keepdims=True))
    z_w_ref[...] = (z_w_ref[...] * jnp.exp((m_s_old - m_s_new) * inv_t)
                    + jnp.sum(e_w, axis=-1, keepdims=True))
    m_s_ref[...] = m_s_new

    # ---- teacher lm_head tile fused in-kernel (never round-trips HBM) -------
    t_logits = jnp.dot(t_hid_ref[...], t_head_ref[...],
                       preferred_element_type=jnp.float32)
    if mask_cols:
        t_use = jnp.where(lane_ok, t_logits, -jnp.inf)
    else:
        t_use = t_logits

    m_t_old = m_t_ref[...]
    m_t_new = jnp.maximum(m_t_old, jnp.max(t_use, axis=-1, keepdims=True))
    e_u = jnp.exp((t_use - m_t_new) * inv_t)
    scale_t = jnp.exp((m_t_old - m_t_new) * inv_t)
    z_u_ref[...] = z_u_ref[...] * scale_t + jnp.sum(e_u, axis=-1, keepdims=True)
    # A = sum_v exp(u - m_u) * (u - w)   with u = t/T, w = s/T
    a_ref[...] = (a_ref[...] * scale_t
                  + jnp.sum(e_u * ((t_logits - s_logits) * inv_t),
                            axis=-1, keepdims=True))
    m_t_ref[...] = m_t_new

    # ---- per-row finalize at the last vocab tile -----------------------------
    @pl.when(j == nv - 1)
    def _row_done():
        z_u = z_u_ref[...]
        # KL_row = E_p[u - w] + lse_w - lse_u  (per-row reciprocal: cheap, exact)
        kd_row = (a_ref[...] / z_u
                  + (inv_t * m_s_ref[...] + jnp.log(z_w_ref[...]))
                  - (inv_t * m_t_ref[...] + jnp.log(z_u)))
        lse_c = m_s_ref[...] + jnp.log(z_c_ref[...])
        valid = mask_ref[...]                              # (tm, 1) f32
        ce_row = (lse_c - tgt_ref[...]) * valid
        acc_ref[0] += jnp.sum(kd_row)
        acc_ref[1] += jnp.sum(ce_row)
        acc_ref[2] += jnp.sum(valid)

    @pl.when((i == pl.num_programs(0) - 1) & (j == nv - 1))
    def _finalize():
        kd_ref[0, 0] = acc_ref[0] * (temperature * temperature) * inv_batch
        ce_ref[0, 0] = acc_ref[1] / jnp.maximum(acc_ref[2], 1.0)


# ----------------------------------------------------------------------------
# Generation-aware tile selection.
# ----------------------------------------------------------------------------
def _choose_tiles(h, v, logits_itemsize, row_tile=None, col_tile=None):
    # Physical VMEM per TensorCore; conservative fallback if the query fails.
    phys = 64 * 1024 * 1024
    try:
        info = pltpu.get_tpu_info()
        phys = int(getattr(info, "vmem_capacity_bytes", phys))
    except Exception:
        pass
    # ~96 MiB usable on v5e/v6e (128 MiB), ~48 MiB on v7x (64 MiB).
    budget = min(phys * 3 // 4, phys - (16 << 20))
    vmem_limit = min(phys, budget + (16 << 20))

    v128 = _round_up(v, 128)
    if col_tile is not None:
        tv = _round_up(int(col_tile), 128)
    else:
        tv = min(v128, 1024)
        # Streamed heads (2 heads x 2 buffers, bf16) must leave room for rows.
        while tv > 128 and 8 * h * tv > budget // 2:
            tv //= 2
    tv = max(128, min(tv, v128))

    if row_tile is not None:
        tm = _round_up(int(row_tile), 16)
    else:
        head_bytes = 8 * h * tv                          # 2 heads x 2 bufs x bf16
        # per-row: 2 hidden (bf16, double buffered) + logits out (double buffered)
        #          + ~8 live (tm, tv) f32 temporaries + (tm, 1) scratch rows.
        per_row = 8 * h + (2 * logits_itemsize + 32) * tv + 4096
        tm = max(16, (budget - head_bytes) // per_row)
        if tm >= 256:
            tm = (tm // 256) * 256                       # MXU-friendly granularity
        else:
            tm = (tm // 16) * 16                         # bf16 sublane pack
        tm = int(max(16, min(1024, tm)))
    return tm, tv, int(vmem_limit)


# ----------------------------------------------------------------------------
# Host wrapper around the fused kernel.
# ----------------------------------------------------------------------------
def token_level_kd_pallas(s_hidden, t_hidden, s_head, t_head,
                          ce_labels, ce_mask, *, temperature, batch_size,
                          row_tile=None, col_tile=None,
                          logits_dtype=jnp.float32):
    n, h = s_hidden.shape
    v = s_head.shape[1]
    tm, tv, vmem_limit = _choose_tiles(h, v, jnp.dtype(logits_dtype).itemsize,
                                       row_tile, col_tile)
    tm = min(tm, _round_up(n, 16))          # never over-pad tiny inputs

    n_pad = _round_up(n, tm)
    v_pad = _round_up(v, tv)
    mask_cols = (v_pad != v)

    if n_pad != n:
        pad = n_pad - n
        # Zero rows contribute 0 to the KL sum (uniform vs uniform) and have
        # ce_mask == 0, so row padding is loss-neutral.
        s_hidden = jnp.pad(s_hidden, ((0, pad), (0, 0)))
        t_hidden = jnp.pad(t_hidden, ((0, pad), (0, 0)))
        ce_labels = jnp.pad(ce_labels, ((0, pad), (0, 0)))
        ce_mask = jnp.pad(ce_mask, ((0, pad), (0, 0)))
    if mask_cols:
        # Padded vocab columns are masked to -inf inside the kernel (excluded
        # from every max / exp-sum), so zero-padding the heads is loss-neutral.
        s_head = jnp.pad(s_head, ((0, 0), (0, v_pad - v)))
        t_head = jnp.pad(t_head, ((0, 0), (0, v_pad - v)))

    grid = (n_pad // tm, v_pad // tv)
    kernel = functools.partial(
        _fused_kd_kernel,
        temperature=float(temperature),
        inv_batch=1.0 / float(batch_size),
        col_tile=tv, vocab_real=v, mask_cols=mask_cols)

    logits, kd, ce = pl.pallas_call(
        kernel,
        out_shape=(
            jax.ShapeDtypeStruct((n_pad, v_pad), logits_dtype),
            jax.ShapeDtypeStruct((1, 1), jnp.float32),
            jax.ShapeDtypeStruct((1, 1), jnp.float32),
        ),
        grid_spec=pltpu.PrefetchScalarGridSpec(
            num_scalar_prefetch=0,
            grid=grid,
            in_specs=[
                pl.BlockSpec((tm, h), lambda i, j: (i, 0)),   # student hidden (bf16)
                pl.BlockSpec((tm, h), lambda i, j: (i, 0)),   # teacher hidden (bf16)
                pl.BlockSpec((h, tv), lambda i, j: (0, j)),   # student head tile (bf16, streamed)
                pl.BlockSpec((h, tv), lambda i, j: (0, j)),   # teacher head tile (bf16, streamed)
                pl.BlockSpec((tm, 1), lambda i, j: (i, 0)),   # shifted CE labels (int32)
                pl.BlockSpec((tm, 1), lambda i, j: (i, 0)),   # CE valid mask (f32)
            ],
            out_specs=[
                pl.BlockSpec((tm, tv), lambda i, j: (i, j)),  # student logits (lane-dense)
                pl.BlockSpec((1, 1), lambda i, j: (0, 0),
                             memory_space=pltpu.MemorySpace.SMEM),
                pl.BlockSpec((1, 1), lambda i, j: (0, 0),
                             memory_space=pltpu.MemorySpace.SMEM),
            ],
            scratch_shapes=[
                pltpu.SMEM((3,), jnp.float32),                # KD / CE / count sums
                pltpu.VMEM((tm, 1), jnp.float32),             # m_s (student running max)
                pltpu.VMEM((tm, 1), jnp.float32),             # m_t (teacher running max)
                pltpu.VMEM((tm, 1), jnp.float32),             # z_u
                pltpu.VMEM((tm, 1), jnp.float32),             # z_w
                pltpu.VMEM((tm, 1), jnp.float32),             # z_c
                pltpu.VMEM((tm, 1), jnp.float32),             # a (cross term)
                pltpu.VMEM((tm, 1), jnp.float32),             # tgt logit
            ],
        ),
        compiler_params=pltpu.CompilerParams(
            # Row axis carries the scalar KD/CE reduction; V axis carries the
            # online-softmax accumulation -> both sequential.
            # TODO(synk): per-row-tile partials + JAX reduce would let the row
            # axis go core-parallel on v7x's 2 TensorCores.
            dimension_semantics=("arbitrary", "arbitrary"),
            vmem_limit_bytes=vmem_limit,
        ),
    )(s_hidden, t_hidden, s_head, t_head, ce_labels, ce_mask)

    return logits[:n, :v], kd[0, 0], ce[0, 0]


# ----------------------------------------------------------------------------
# Tiny synthetic causal LM standing in for the HF student / teacher models.
# ----------------------------------------------------------------------------
def init_lm_params(key, vocab, hidden, scale=0.5):
    k_emb, k_head = jax.random.split(key)
    return {
        "emb": jax.random.normal(k_emb, (vocab, hidden), jnp.float32) * scale,
        "head": jax.random.normal(k_head, (hidden, vocab), jnp.float32) * scale,
    }


# ----------------------------------------------------------------------------
# TokenLevelKD.forward
# ----------------------------------------------------------------------------
def token_level_kd_forward(student_params, teacher_params, input_ids,
                           attention_mask, labels, temperature=1.0,
                           row_tile=None, col_tile=None,
                           logits_dtype=jnp.float32):
    b, s = input_ids.shape
    h = student_params["emb"].shape[1]
    v = student_params["head"].shape[1]
    n = b * s
    maskf = attention_mask.astype(jnp.float32)[..., None]

    # Embedding lookup is glue; hidden states go to the kernel in bf16 so both
    # lm_head matmuls hit the MXU's native bf16 path (f32 accumulation inside).
    s_hidden = (student_params["emb"][input_ids] * maskf).reshape(n, h)
    s_hidden = s_hidden.astype(jnp.bfloat16)
    t_hidden = jax.lax.stop_gradient(                      # torch.no_grad()
        (teacher_params["emb"][input_ids] * maskf).reshape(n, h)
    ).astype(jnp.bfloat16)
    s_head = student_params["head"].astype(jnp.bfloat16)
    t_head = jax.lax.stop_gradient(teacher_params["head"]).astype(jnp.bfloat16)

    # HF-style causal-LM CE glue: position t predicts labels[t+1]; -100 ignored.
    shift_tgt = jnp.concatenate(
        [labels[:, 1:], jnp.full((b, 1), -100, labels.dtype)], axis=1)
    valid = shift_tgt != -100
    ce_labels = jnp.where(valid, shift_tgt, 0).astype(jnp.int32).reshape(n, 1)
    ce_mask = valid.astype(jnp.float32).reshape(n, 1)

    # KL 'batchmean' divides by input.size(0) = B for (B, S, V) logits,
    # matching the torch module exactly.
    logits_flat, kd, ce = token_level_kd_pallas(
        s_hidden, t_hidden, s_head, t_head, ce_labels, ce_mask,
        temperature=temperature, batch_size=b,
        row_tile=row_tile, col_tile=col_tile, logits_dtype=logits_dtype)

    logits = logits_flat.reshape(b, s, v)
    return {"loss": ce + kd, "kd_loss": kd, "ce_loss": ce, "logits": logits}


if __name__ == "__main__":
    B, S, H, V = 2, 16, 32, 256
    TEMPERATURE = 2.0
    # Small explicit tiles so the toy shapes exercise BOTH grid axes
    # (2 row tiles x 2 vocab tiles -> online-softmax + scalar accumulation).
    ROW_TILE, COL_TILE = 16, 128

    key = jax.random.PRNGKey(0)
    k_student, k_teacher, k_ids = jax.random.split(key, 3)

    student_params = init_lm_params(k_student, V, H)
    teacher_params = init_lm_params(k_teacher, V, H)

    input_ids = jax.random.randint(k_ids, (B, S), 0, V, dtype=jnp.int32)
    attention_mask = jnp.ones((B, S), dtype=jnp.int32)
    labels = input_ids.at[:, :3].set(-100)   # mask a "prompt" prefix

    out = token_level_kd_forward(
        student_params, teacher_params, input_ids, attention_mask, labels,
        temperature=TEMPERATURE, row_tile=ROW_TILE, col_tile=COL_TILE,
    )
    jax.block_until_ready(out)

    # ---- pure-JAX reference (same bf16-input / f32-accumulate matmul path) --
    def ref():
        maskf = attention_mask.astype(jnp.float32)[..., None]
        sh = (student_params["emb"][input_ids] * maskf).astype(jnp.bfloat16)
        th = (teacher_params["emb"][input_ids] * maskf).astype(jnp.bfloat16)
        s_logits = jnp.einsum("bsh,hv->bsv", sh,
                              student_params["head"].astype(jnp.bfloat16),
                              preferred_element_type=jnp.float32)
        t_logits = jnp.einsum("bsh,hv->bsv", th,
                              teacher_params["head"].astype(jnp.bfloat16),
                              preferred_element_type=jnp.float32)
        log_q = jax.nn.log_softmax(s_logits / TEMPERATURE, axis=-1)
        log_p = jax.nn.log_softmax(t_logits / TEMPERATURE, axis=-1)
        p = jnp.exp(log_p)
        kd = jnp.sum(p * (log_p - log_q)) / B * TEMPERATURE ** 2
        sl = s_logits[:, :-1, :].reshape(-1, V)
        tl = labels[:, 1:].reshape(-1)
        vmask = tl != -100
        tgt = jnp.take_along_axis(sl, jnp.where(vmask, tl, 0)[:, None], 1)[:, 0]
        per_tok = jax.nn.logsumexp(sl, axis=-1) - tgt
        ce = jnp.sum(jnp.where(vmask, per_tok, 0.0)) / jnp.maximum(vmask.sum(), 1)
        return s_logits, kd, ce

    logits_ref, kd_ref, ce_ref = ref()
    assert out["logits"].shape == (B, S, V)
    assert jnp.allclose(out["logits"], logits_ref, rtol=1e-3, atol=1e-3)
    assert jnp.allclose(out["kd_loss"], kd_ref, rtol=2e-3, atol=2e-3)
    assert jnp.allclose(out["ce_loss"], ce_ref, rtol=2e-3, atol=2e-3)
    assert jnp.allclose(out["loss"], kd_ref + ce_ref, rtol=2e-3, atol=2e-3)

    print("KERNEL_OK")
</pallas_src>

<mosaic_0001>
module attributes {stable_mosaic.version = 11 : i64} {
  func.func @_fused_kd_kernel(%arg0: i32, %arg1: i32, %arg2: memref<16x32xbf16, #tpu.memory_space<vmem>>, %arg3: memref<16x32xbf16, #tpu.memory_space<vmem>>, %arg4: memref<32x128xbf16, #tpu.memory_space<vmem>>, %arg5: memref<32x128xbf16, #tpu.memory_space<vmem>>, %arg6: memref<16x1xi32, #tpu.memory_space<vmem>>, %arg7: memref<16x1xf32, #tpu.memory_space<vmem>>, %arg8: memref<16x128xf32, #tpu.memory_space<vmem>>, %arg9: memref<1x1xf32, #tpu.memory_space<smem>>, %arg10: memref<1x1xf32, #tpu.memory_space<smem>>, %arg11: memref<3xf32, #tpu.memory_space<smem>>, %arg12: memref<16x1xf32, #tpu.memory_space<vmem>>, %arg13: memref<16x1xf32, #tpu.memory_space<vmem>>, %arg14: memref<16x1xf32, #tpu.memory_space<vmem>>, %arg15: memref<16x1xf32, #tpu.memory_space<vmem>>, %arg16: memref<16x1xf32, #tpu.memory_space<vmem>>, %arg17: memref<16x1xf32, #tpu.memory_space<vmem>>, %arg18: memref<16x1xf32, #tpu.memory_space<vmem>>) attributes {dimension_semantics = [#tpu.dimension_semantics<arbitrary>, #tpu.dimension_semantics<arbitrary>], iteration_bounds = array<i64: 2, 2>, scalar_prefetch = 0 : i64, scratch_operands = 8 : i64, tpu.core_type = #tpu.core_type<tc>, window_params = [{transform_indices = @transform_0, window_bounds = array<i64: 16, 32>}, {transform_indices = @transform_1, window_bounds = array<i64: 16, 32>}, {transform_indices = @transform_2, window_bounds = array<i64: 32, 128>}, {transform_indices = @transform_3, window_bounds = array<i64: 32, 128>}, {transform_indices = @transform_4, window_bounds = array<i64: 16, 1>}, {transform_indices = @transform_5, window_bounds = array<i64: 16, 1>}, {transform_indices = @transform_6, window_bounds = array<i64: 16, 128>}, {transform_indices = @transform_7, window_bounds = array<i64: 1, 1>}, {transform_indices = @transform_8, window_bounds = array<i64: 1, 1>}]} {
    %c0_i32 = arith.constant 0 : i32
    %0 = arith.cmpi eq, %arg0, %c0_i32 : i32
    %c0_i32_0 = arith.constant 0 : i32
    %1 = arith.cmpi eq, %arg1, %c0_i32_0 : i32
    %2 = arith.andi %0, %1 : i1
    %3 = arith.extui %2 : i1 to i32
    %c0_i32_1 = arith.constant 0 : i32
    %4 = arith.cmpi ne, %3, %c0_i32_1 : i32
    scf.if %4 {
      %cst_61 = arith.constant 0.000000e+00 : f32
      %c0_62 = arith.constant 0 : index
      %98 = memref.load %arg11[%c0_62] : memref<3xf32, #tpu.memory_space<smem>>
      memref.store %cst_61, %arg11[%c0_62] : memref<3xf32, #tpu.memory_space<smem>>
      %cst_63 = arith.constant 0.000000e+00 : f32
      %c1 = arith.constant 1 : index
      %99 = memref.load %arg11[%c1] : memref<3xf32, #tpu.memory_space<smem>>
      memref.store %cst_63, %arg11[%c1] : memref<3xf32, #tpu.memory_space<smem>>
      %cst_64 = arith.constant 0.000000e+00 : f32
      %c2 = arith.constant 2 : index
      %100 = memref.load %arg11[%c2] : memref<3xf32, #tpu.memory_space<smem>>
      memref.store %cst_64, %arg11[%c2] : memref<3xf32, #tpu.memory_space<smem>>
    } else {
    }
    %c0_i32_2 = arith.constant 0 : i32
    %5 = arith.cmpi eq, %arg1, %c0_i32_2 : i32
    %6 = arith.extui %5 : i1 to i32
    %c0_i32_3 = arith.constant 0 : i32
    %7 = arith.cmpi ne, %6, %c0_i32_3 : i32
    scf.if %7 {
      %cst_61 = arith.constant 0xFF800000 : f32
      %98 = vector.broadcast %cst_61 : f32 to vector<16x1xf32>
      %c0_62 = arith.constant 0 : index
      %c0_63 = arith.constant 0 : index
      %99 = vector.load %arg12[%c0_62, %c0_63] : memref<16x1xf32, #tpu.memory_space<vmem>>, vector<16x1xf32>
      tpu.vector_store %arg12[%c0_62, %c0_63], %98 {strides = array<i32>} : memref<16x1xf32, #tpu.memory_space<vmem>>, vector<16x1xf32>,
      %c0_64 = arith.constant 0 : index
      %c0_65 = arith.constant 0 : index
      %100 = vector.load %arg13[%c0_64, %c0_65] : memref<16x1xf32, #tpu.memory_space<vmem>>, vector<16x1xf32>
      tpu.vector_store %arg13[%c0_64, %c0_65], %98 {strides = array<i32>} : memref<16x1xf32, #tpu.memory_space<vmem>>, vector<16x1xf32>,
      %cst_66 = arith.constant 0.000000e+00 : f32
      %101 = vector.broadcast %cst_66 : f32 to vector<16x1xf32>
      %c0_67 = arith.constant 0 : index
      %c0_68 = arith.constant 0 : index
      %102 = vector.load %arg14[%c0_67, %c0_68] : memref<16x1xf32, #tpu.memory_space<vmem>>, vector<16x1xf32>
      tpu.vector_store %arg14[%c0_67, %c0_68], %101 {strides = array<i32>} : memref<16x1xf32, #tpu.memory_space<vmem>>, vector<16x1xf32>,
      %cst_69 = arith.constant 0.000000e+00 : f32
      %103 = vector.broadcast %cst_69 : f32 to vector<16x1xf32>
      %c0_70 = arith.constant 0 : index
      %c0_71 = arith.constant 0 : index
      %104 = vector.load %arg15[%c0_70, %c0_71] : memref<16x1xf32, #tpu.memory_space<vmem>>, vector<16x1xf32>
      tpu.vector_store %arg15[%c0_70, %c0_71], %103 {strides = array<i32>} : memref<16x1xf32, #tpu.memory_space<vmem>>, vector<16x1xf32>,
      %cst_72 = arith.constant 0.000000e+00 : f32
      %105 = vector.broadcast %cst_72 : f32 to vector<16x1xf32>
      %c0_73 = arith.constant 0 : index
      %c0_74 = arith.constant 0 : index
      %106 = vector.load %arg16[%c0_73, %c0_74] : memref<16x1xf32, #tpu.memory_space<vmem>>, vector<16x1xf32>
      tpu.vector_store %arg16[%c0_73, %c0_74], %105 {strides = array<i32>} : memref<16x1xf32, #tpu.memory_space<vmem>>, vector<16x1xf32>,
      %cst_75 = arith.constant 0.000000e+00 : f32
      %107 = vector.broadcast %cst_75 : f32 to vector<16x1xf32>
      %c0_76 = arith.constant 0 : index
      %c0_77 = arith.constant 0 : index
      %108 = vector.load %arg17[%c0_76, %c0_77] : memref<16x1xf32, #tpu.memory_space<vmem>>, vector<16x1xf32>
      tpu.vector_store %arg17[%c0_76, %c0_77], %107 {strides = array<i32>} : memref<16x1xf32, #tpu.memory_space<vmem>>, vector<16x1xf32>,
      %cst_78 = arith.constant 0.000000e+00 : f32
      %109 = vector.broadcast %cst_78 : f32 to vector<16x1xf32>
      %c0_79 = arith.constant 0 : index
      %c0_80 = arith.constant 0 : index
      %110 = vector.load %arg18[%c0_79, %c0_80] : memref<16x1xf32, #tpu.memory_space<vmem>>, vector<16x1xf32>
      tpu.vector_store %arg18[%c0_79, %c0_80], %109 {strides = array<i32>} : memref<16x1xf32, #tpu.memory_space<vmem>>, vector<16x1xf32>,
    } else {
    }
    %c0 = arith.constant 0 : index
    %c0_4 = arith.constant 0 : index
    %8 = vector.load %arg2[%c0, %c0_4] : memref<16x32xbf16, #tpu.memory_space<vmem>>, vector<16x32xbf16>
    %c0_5 = arith.constant 0 : index
    %c0_6 = arith.constant 0 : index
    %9 = vector.load %arg4[%c0_5, %c0_6] : memref<32x128xbf16, #tpu.memory_space<vmem>>, vector<32x128xbf16>
    %cst = arith.constant dense<0.000000e+00> : vector<16x128xf32>
    %10 = tpu.matmul %8, %9, %cst {dimension_numbers = #tpu.dot_dimension_numbers<[1], [0], [0], [1], [0, 0, 1, 1], [], []>} : vector<16x32xbf16>, vector<32x128xbf16>, vector<16x128xf32> -> vector<16x128xf32>
    %c0_7 = arith.constant 0 : index
    %c0_8 = arith.constant 0 : index
    %11 = vector.load %arg8[%c0_7, %c0_8] : memref<16x128xf32, #tpu.memory_space<vmem>>, vector<16x128xf32>
    tpu.vector_store %arg8[%c0_7, %c0_8], %10 {strides = array<i32>} : memref<16x128xf32, #tpu.memory_space<vmem>>, vector<16x128xf32>,
    %12 = tpu.iota {dimensions = array<i32: 1>} : vector<16x128xi32>
    %c128_i32 = arith.constant 128 : i32
    %13 = arith.muli %arg1, %c128_i32 : i32
    %14 = vector.broadcast %13 : i32 to vector<16x128xi32>
    %15 = arith.addi %12, %14 : vector<16x128xi32>
    %c0_9 = arith.constant 0 : index
    %c0_10 = arith.constant 0 : index
    %16 = vector.load %arg6[%c0_9, %c0_10] : memref<16x1xi32, #tpu.memory_space<vmem>>, vector<16x1xi32>
    %c0_11 = arith.constant 0 : index
    %c0_12 = arith.constant 0 : index
    %17 = vector.load %arg18[%c0_11, %c0_12] : memref<16x1xf32, #tpu.memory_space<vmem>>, vector<16x1xf32>
    %18 = vector.broadcast %16 : vector<16x1xi32> to vector<16x128xi32>
    %19 = arith.cmpi eq, %15, %18 : vector<16x128xi32>
    %cst_13 = arith.constant 0.000000e+00 : f32
    %20 = vector.broadcast %cst_13 : f32 to vector<16x128xf32>
    %21 = arith.select %19, %10, %20 : vector<16x128xi1>, vector<16x128xf32>
    %cst_14 = arith.constant dense<0.000000e+00> : vector<16xf32>
    %22 = vector.multi_reduction <add>, %21, %cst_14 [1] : vector<16x128xf32> to vector<16xf32>
    %23 = vector.shape_cast %22 : vector<16xf32> to vector<16x1xf32>
    %24 = arith.addf %17, %23 : vector<16x1xf32>
    %c0_15 = arith.constant 0 : index
    %c0_16 = arith.constant 0 : index
    %25 = vector.load %arg18[%c0_15, %c0_16] : memref<16x1xf32, #tpu.memory_space<vmem>>, vector<16x1xf32>
    tpu.vector_store %arg18[%c0_15, %c0_16], %24 {strides = array<i32>} : memref<16x1xf32, #tpu.memory_space<vmem>>, vector<16x1xf32>,
    %c0_17 = arith.constant 0 : index
    %c0_18 = arith.constant 0 : index
    %26 = vector.load %arg12[%c0_17, %c0_18] : memref<16x1xf32, #tpu.memory_space<vmem>>, vector<16x1xf32>
    %cst_19 = arith.constant dense<0xFF800000> : vector<16xf32>
    %27 = vector.multi_reduction <maximumf>, %10, %cst_19 [1] : vector<16x128xf32> to vector<16xf32>
    %28 = vector.shape_cast %27 : vector<16xf32> to vector<16x1xf32>
    %29 = arith.maximumf %26, %28 : vector<16x1xf32>
    %30 = vector.broadcast %29 : vector<16x1xf32> to vector<16x128xf32>
    %31 = arith.subf %10, %30 : vector<16x128xf32>
    %32 = math.exp %31 : vector<16x128xf32>
    %33 = vector.broadcast %29 : vector<16x1xf32> to vector<16x128xf32>
    %34 = arith.subf %10, %33 : vector<16x128xf32>
    %cst_20 = arith.constant 5.000000e-01 : f32
    %35 = vector.broadcast %cst_20 : f32 to vector<16x128xf32>
    %36 = arith.mulf %34, %35 : vector<16x128xf32>
    %37 = math.exp %36 : vector<16x128xf32>
    %c0_21 = arith.constant 0 : index
    %c0_22 = arith.constant 0 : index
    %38 = vector.load %arg16[%c0_21, %c0_22] : memref<16x1xf32, #tpu.memory_space<vmem>>, vector<16x1xf32>
    %39 = arith.subf %26, %29 : vector<16x1xf32>
    %40 = math.exp %39 : vector<16x1xf32>
    %41 = arith.mulf %38, %40 : vector<16x1xf32>
    %cst_23 = arith.constant dense<0.000000e+00> : vector<16xf32>
    %42 = vector.multi_reduction <add>, %32, %cst_23 [1] : vector<16x128xf32> to vector<16xf32>
    %43 = vector.shape_cast %42 : vector<16xf32> to vector<16x1xf32>
    %44 = arith.addf %41, %43 : vector<16x1xf32>
    %c0_24 = arith.constant 0 : index
    %c0_25 = arith.constant 0 : index
    %45 = vector.load %arg16[%c0_24, %c0_25] : memref<16x1xf32, #tpu.memory_space<vmem>>, vector<16x1xf32>
    tpu.vector_store %arg16[%c0_24, %c0_25], %44 {strides = array<i32>} : memref<16x1xf32, #tpu.memory_space<vmem>>, vector<16x1xf32>,
    %c0_26 = arith.constant 0 : index
    %c0_27 = arith.constant 0 : index
    %46 = vector.load %arg15[%c0_26, %c0_27] : memref<16x1xf32, #tpu.memory_space<vmem>>, vector<16x1xf32>
    %47 = arith.subf %26, %29 : vector<16x1xf32>
    %cst_28 = arith.constant 5.000000e-01 : f32
    %48 = vector.broadcast %cst_28 : f32 to vector<16x1xf32>
    %49 = arith.mulf %47, %48 : vector<16x1xf32>
    %50 = math.exp %49 : vector<16x1xf32>
    %51 = arith.mulf %46, %50 : vector<16x1xf32>
    %cst_29 = arith.constant dense<0.000000e+00> : vector<16xf32>
    %52 = vector.multi_reduction <add>, %37, %cst_29 [1] : vector<16x128xf32> to vector<16xf32>
    %53 = vector.shape_cast %52 : vector<16xf32> to vector<16x1xf32>
    %54 = arith.addf %51, %53 : vector<16x1xf32>
    %c0_30 = arith.constant 0 : index
    %c0_31 = arith.constant 0 : index
    %55 = vector.load %arg15[%c0_30, %c0_31] : memref<16x1xf32, #tpu.memory_space<vmem>>, vector<16x1xf32>
    tpu.vector_store %arg15[%c0_30, %c0_31], %54 {strides = array<i32>} : memref<16x1xf32, #tpu.memory_space<vmem>>, vector<16x1xf32>,
    %c0_32 = arith.constant 0 : index
    %c0_33 = arith.constant 0 : index
    %56 = vector.load %arg12[%c0_32, %c0_33] : memref<16x1xf32, #tpu.memory_space<vmem>>, vector<16x1xf32>
    tpu.vector_store %arg12[%c0_32, %c0_33], %29 {strides = array<i32>} : memref<16x1xf32, #tpu.memory_space<vmem>>, vector<16x1xf32>,
    %c0_34 = arith.constant 0 : index
    %c0_35 = arith.constant 0 : index
    %57 = vector.load %arg3[%c0_34, %c0_35] : memref<16x32xbf16, #tpu.memory_space<vmem>>, vector<16x32xbf16>
    %c0_36 = arith.constant 0 : index
    %c0_37 = arith.constant 0 : index
    %58 = vector.load %arg5[%c0_36, %c0_37] : memref<32x128xbf16, #tpu.memory_space<vmem>>, vector<32x128xbf16>
    %cst_38 = arith.constant dense<0.000000e+00> : vector<16x128xf32>
    %59 = tpu.matmul %57, %58, %cst_38 {dimension_numbers = #tpu.dot_dimension_numbers<[1], [0], [0], [1], [0, 0, 1, 1], [], []>} : vector<16x32xbf16>, vector<32x128xbf16>, vector<16x128xf32> -> vector<16x128xf32>
    %c0_39 = arith.constant 0 : index
    %c0_40 = arith.constant 0 : index
    %60 = vector.load %arg13[%c0_39, %c0_40] : memref<16x1xf32, #tpu.memory_space<vmem>>, vector<16x1xf32>
    %cst_41 = arith.constant dense<0xFF800000> : vector<16xf32>
    %61 = vector.multi_reduction <maximumf>, %59, %cst_41 [1] : vector<16x128xf32> to vector<16xf32>
    %62 = vector.shape_cast %61 : vector<16xf32> to vector<16x1xf32>
    %63 = arith.maximumf %60, %62 : vector<16x1xf32>
    %64 = vector.broadcast %63 : vector<16x1xf32> to vector<16x128xf32>
    %65 = arith.subf %59, %64 : vector<16x128xf32>
    %cst_42 = arith.constant 5.000000e-01 : f32
    %66 = vector.broadcast %cst_42 : f32 to vector<16x128xf32>
    %67 = arith.mulf %65, %66 : vector<16x128xf32>
    %68 = math.exp %67 : vector<16x128xf32>
    %69 = arith.subf %60, %63 : vector<16x1xf32>
    %cst_43 = arith.constant 5.000000e-01 : f32
    %70 = vector.broadcast %cst_43 : f32 to vector<16x1xf32>
    %71 = arith.mulf %69, %70 : vector<16x1xf32>
    %72 = math.exp %71 : vector<16x1xf32>
    %c0_44 = arith.constant 0 : index
    %c0_45 = arith.constant 0 : index
    %73 = vector.load %arg14[%c0_44, %c0_45] : memref<16x1xf32, #tpu.memory_space<vmem>>, vector<16x1xf32>
    %74 = arith.mulf %73, %72 : vector<16x1xf32>
    %cst_46 = arith.constant dense<0.000000e+00> : vector<16xf32>
    %75 = vector.multi_reduction <add>, %68, %cst_46 [1] : vector<16x128xf32> to vector<16xf32>
    %76 = vector.shape_cast %75 : vector<16xf32> to vector<16x1xf32>
    %77 = arith.addf %74, %76 : vector<16x1xf32>
    %c0_47 = arith.constant 0 : index
    %c0_48 = arith.constant 0 : index
    %78 = vector.load %arg14[%c0_47, %c0_48] : memref<16x1xf32, #tpu.memory_space<vmem>>, vector<16x1xf32>
    tpu.vector_store %arg14[%c0_47, %c0_48], %77 {strides = array<i32>} : memref<16x1xf32, #tpu.memory_space<vmem>>, vector<16x1xf32>,
    %c0_49 = arith.constant 0 : index
    %c0_50 = arith.constant 0 : index
    %79 = vector.load %arg17[%c0_49, %c0_50] : memref<16x1xf32, #tpu.memory_space<vmem>>, vector<16x1xf32>
    %80 = arith.mulf %79, %72 : vector<16x1xf32>
    %81 = arith.subf %59, %10 : vector<16x128xf32>
    %cst_51 = arith.constant 5.000000e-01 : f32
    %82 = vector.broadcast %cst_51 : f32 to vector<16x128xf32>
    %83 = arith.mulf %81, %82 : vector<16x128xf32>
    %84 = arith.mulf %68, %83 : vector<16x128xf32>
    %cst_52 = arith.constant dense<0.000000e+00> : vector<16xf32>
    %85 = vector.multi_reduction <add>, %84, %cst_52 [1] : vector<16x128xf32> to vector<16xf32>
    %86 = vector.shape_cast %85 : vector<16xf32> to vector<16x1xf32>
    %87 = arith.addf %80, %86 : vector<16x1xf32>
    %c0_53 = arith.constant 0 : index
    %c0_54 = arith.constant 0 : index
    %88 = vector.load %arg17[%c0_53, %c0_54] : memref<16x1xf32, #tpu.memory_space<vmem>>, vector<16x1xf32>
    tpu.vector_store %arg17[%c0_53, %c0_54], %87 {strides = array<i32>} : memref<16x1xf32, #tpu.memory_space<vmem>>, vector<16x1xf32>,
    %c0_55 = arith.constant 0 : index
    %c0_56 = arith.constant 0 : index
    %89 = vector.load %arg13[%c0_55, %c0_56] : memref<16x1xf32, #tpu.memory_space<vmem>>, vector<16x1xf32>
    tpu.vector_store %arg13[%c0_55, %c0_56], %63 {strides = array<i32>} : memref<16x1xf32, #tpu.memory_space<vmem>>, vector<16x1xf32>,
    %c1_i32 = arith.constant 1 : i32
    %90 = arith.cmpi eq, %arg1, %c1_i32 : i32
    %91 = arith.extui %90 : i1 to i32
    %c0_i32_57 = arith.constant 0 : i32
    %92 = arith.cmpi ne, %91, %c0_i32_57 : i32
    scf.if %92 {
      %c0_61 = arith.constant 0 : index
      %c0_62 = arith.constant 0 : index
      %98 = vector.load %arg14[%c0_61, %c0_62] : memref<16x1xf32, #tpu.memory_space<vmem>>, vector<16x1xf32>
      %c0_63 = arith.constant 0 : index
      %c0_64 = arith.constant 0 : index
      %99 = vector.load %arg17[%c0_63, %c0_64] : memref<16x1xf32, #tpu.memory_space<vmem>>, vector<16x1xf32>
      %100 = arith.divf %99, %98 : vector<16x1xf32>
      %c0_65 = arith.constant 0 : index
      %c0_66 = arith.constant 0 : index
      %101 = vector.load %arg12[%c0_65, %c0_66] : memref<16x1xf32, #tpu.memory_space<vmem>>, vector<16x1xf32>
      %cst_67 = arith.constant 5.000000e-01 : f32
      %102 = vector.broadcast %cst_67 : f32 to vector<16x1xf32>
      %103 = arith.mulf %102, %101 : vector<16x1xf32>
      %c0_68 = arith.constant 0 : index
      %c0_69 = arith.constant 0 : index
      %104 = vector.load %arg15[%c0_68, %c0_69] : memref<16x1xf32, #tpu.memory_space<vmem>>, vector<16x1xf32>
      %105 = math.log %104 : vector<16x1xf32>
      %106 = arith.addf %103, %105 : vector<16x1xf32>
      %107 = arith.addf %100, %106 : vector<16x1xf32>
      %c0_70 = arith.constant 0 : index
      %c0_71 = arith.constant 0 : index
      %108 = vector.load %arg13[%c0_70, %c0_71] : memref<16x1xf32, #tpu.memory_space<vmem>>, vector<16x1xf32>
      %cst_72 = arith.constant 5.000000e-01 : f32
      %109 = vector.broadcast %cst_72 : f32 to vector<16x1xf32>
      %110 = arith.mulf %109, %108 : vector<16x1xf32>
      %111 = math.log %98 : vector<16x1xf32>
      %112 = arith.addf %110, %111 : vector<16x1xf32>
      %113 = arith.subf %107, %112 : vector<16x1xf32>
      %c0_73 = arith.constant 0 : index
      %c0_74 = arith.constant 0 : index
      %114 = vector.load %arg12[%c0_73, %c0_74] : memref<16x1xf32, #tpu.memory_space<vmem>>, vector<16x1xf32>
      %c0_75 = arith.constant 0 : index
      %c0_76 = arith.constant 0 : index
      %115 = vector.load %arg16[%c0_75, %c0_76] : memref<16x1xf32, #tpu.memory_space<vmem>>, vector<16x1xf32>
      %116 = math.log %115 : vector<16x1xf32>
      %117 = arith.addf %114, %116 : vector<16x1xf32>
      %c0_77 = arith.constant 0 : index
      %c0_78 = arith.constant 0 : index
      %118 = vector.load %arg7[%c0_77, %c0_78] : memref<16x1xf32, #tpu.memory_space<vmem>>, vector<16x1xf32>
      %c0_79 = arith.constant 0 : index
      %c0_80 = arith.constant 0 : index
      %119 = vector.load %arg18[%c0_79, %c0_80] : memref<16x1xf32, #tpu.memory_space<vmem>>, vector<16x1xf32>
      %120 = arith.subf %117, %119 : vector<16x1xf32>
      %121 = arith.mulf %120, %118 : vector<16x1xf32>
      %c0_81 = arith.constant 0 : index
      %122 = memref.load %arg11[%c0_81] : memref<3xf32, #tpu.memory_space<smem>>
      %123 = vector.shape_cast %113 : vector<16x1xf32> to vector<1x16x1xf32>
      %cst_82 = arith.constant dense<0.000000e+00> : vector<1xf32>
      %124 = vector.multi_reduction <add>, %123, %cst_82 [1, 2] : vector<1x16x1xf32> to vector<1xf32>
      %125 = vector.shape_cast %124 : vector<1xf32> to vector<1x1x1xf32>
      %126 = vector.extract %125[0, 0, 0] : f32 from vector<1x1x1xf32>
      %127 = arith.addf %122, %126 : f32
      %c0_83 = arith.constant 0 : index
      %128 = memref.load %arg11[%c0_83] : memref<3xf32, #tpu.memory_space<smem>>
      memref.store %127, %arg11[%c0_83] : memref<3xf32, #tpu.memory_space<smem>>
      %c1 = arith.constant 1 : index
      %129 = memref.load %arg11[%c1] : memref<3xf32, #tpu.memory_space<smem>>
      %130 = vector.shape_cast %121 : vector<16x1xf32> to vector<1x16x1xf32>
      %cst_84 = arith.constant dense<0.000000e+00> : vector<1xf32>
      %131 = vector.multi_reduction <add>, %130, %cst_84 [1, 2] : vector<1x16x1xf32> to vector<1xf32>
      %132 = vector.shape_cast %131 : vector<1xf32> to vector<1x1x1xf32>
      %133 = vector.extract %132[0, 0, 0] : f32 from vector<1x1x1xf32>
      %134 = arith.addf %129, %133 : f32
      %c1_85 = arith.constant 1 : index
      %135 = memref.load %arg11[%c1_85] : memref<3xf32, #tpu.memory_space<smem>>
      memref.store %134, %arg11[%c1_85] : memref<3xf32, #tpu.memory_space<smem>>
      %c2 = arith.constant 2 : index
      %136 = memref.load %arg11[%c2] : memref<3xf32, #tpu.memory_space<smem>>
      %137 = vector.shape_cast %118 : vector<16x1xf32> to vector<1x16x1xf32>
      %cst_86 = arith.constant dense<0.000000e+00> : vector<1xf32>
      %138 = vector.multi_reduction <add>, %137, %cst_86 [1, 2] : vector<1x16x1xf32> to vector<1xf32>
      %139 = vector.shape_cast %138 : vector<1xf32> to vector<1x1x1xf32>
      %140 = vector.extract %139[0, 0, 0] : f32 from vector<1x1x1xf32>
      %141 = arith.addf %136, %140 : f32
      %c2_87 = arith.constant 2 : index
      %142 = memref.load %arg11[%c2_87] : memref<3xf32, #tpu.memory_space<smem>>
      memref.store %141, %arg11[%c2_87] : memref<3xf32, #tpu.memory_space<smem>>
    } else {
    }
    %c1_i32_58 = arith.constant 1 : i32
    %93 = arith.cmpi eq, %arg0, %c1_i32_58 : i32
    %c1_i32_59 = arith.constant 1 : i32
    %94 = arith.cmpi eq, %arg1, %c1_i32_59 : i32
    %95 = arith.andi %93, %94 : i1
    %96 = arith.extui %95 : i1 to i32
    %c0_i32_60 = arith.constant 0 : i32
    %97 = arith.cmpi ne, %96, %c0_i32_60 : i32
    scf.if %97 {
      %c0_61 = arith.constant 0 : index
      %98 = memref.load %arg11[%c0_61] : memref<3xf32, #tpu.memory_space<smem>>
      %cst_62 = arith.constant 4.000000e+00 : f32
      %99 = arith.mulf %98, %cst_62 : f32
      %cst_63 = arith.constant 5.000000e-01 : f32
      %100 = arith.mulf %99, %cst_63 : f32
      %c0_64 = arith.constant 0 : index
      %c0_65 = arith.constant 0 : index
      %101 = memref.load %arg9[%c0_64, %c0_65] : memref<1x1xf32, #tpu.memory_space<smem>>
      memref.store %100, %arg9[%c0_64, %c0_65] : memref<1x1xf32, #tpu.memory_space<smem>>
      %c1 = arith.constant 1 : index
      %102 = memref.load %arg11[%c1] : memref<3xf32, #tpu.memory_space<smem>>
      %c2 = arith.constant 2 : index
      %103 = memref.load %arg11[%c2] : memref<3xf32, #tpu.memory_space<smem>>
      %cst_66 = arith.constant 1.000000e+00 : f32
      %104 = arith.maximumf %103, %cst_66 : f32
      %105 = arith.divf %102, %104 : f32
      %c0_67 = arith.constant 0 : index
      %c0_68 = arith.constant 0 : index
      %106 = memref.load %arg10[%c0_67, %c0_68] : memref<1x1xf32, #tpu.memory_space<smem>>
      memref.store %105, %arg10[%c0_67, %c0_68] : memref<1x1xf32, #tpu.memory_space<smem>>
    } else {
    }
    return
  }
  func.func @transform_0(%arg0: i32, %arg1: i32) -> (i32, i32) {
    %c0_i32 = arith.constant 0 : i32
    %c0_i32_0 = arith.constant 0 : i32
    return %arg0, %c0_i32 : i32, i32
  }
  func.func @transform_1(%arg0: i32, %arg1: i32) -> (i32, i32) {
    %c0_i32 = arith.constant 0 : i32
    %c0_i32_0 = arith.constant 0 : i32
    return %arg0, %c0_i32 : i32, i32
  }
  func.func @transform_2(%arg0: i32, %arg1: i32) -> (i32, i32) {
    %c0_i32 = arith.constant 0 : i32
    %c0_i32_0 = arith.constant 0 : i32
    return %c0_i32, %arg1 : i32, i32
  }
  func.func @transform_3(%arg0: i32, %arg1: i32) -> (i32, i32) {
    %c0_i32 = arith.constant 0 : i32
    %c0_i32_0 = arith.constant 0 : i32
    return %c0_i32, %arg1 : i32, i32
  }
  func.func @transform_4(%arg0: i32, %arg1: i32) -> (i32, i32) {
    %c0_i32 = arith.constant 0 : i32
    %c0_i32_0 = arith.constant 0 : i32
    return %arg0, %c0_i32 : i32, i32
  }
  func.func @transform_5(%arg0: i32, %arg1: i32) -> (i32, i32) {
    %c0_i32 = arith.constant 0 : i32
    %c0_i32_0 = arith.constant 0 : i32
    return %arg0, %c0_i32 : i32, i32
  }
  func.func @transform_6(%arg0: i32, %arg1: i32) -> (i32, i32) {
    %c0_i32 = arith.constant 0 : i32
    return %arg0, %arg1 : i32, i32
  }
  func.func @transform_7(%arg0: i32, %arg1: i32) -> (i32, i32) {
    %c0_i32 = arith.constant 0 : i32
    %c0_i32_0 = arith.constant 0 : i32
    %c0_i32_1 = arith.constant 0 : i32
    return %c0_i32, %c0_i32_0 : i32, i32
  }
  func.func @transform_8(%arg0: i32, %arg1: i32) -> (i32, i32) {
    %c0_i32 = arith.constant 0 : i32
    %c0_i32_0 = arith.constant 0 : i32
    %c0_i32_1 = arith.constant 0 : i32
    return %c0_i32, %c0_i32_0 : i32, i32
  }
}

</mosaic_0001>

<bundles_post_ra>
// kernel: tpu_custom_call.1
= control target key start
LH: loop header
LB: loop body
LE: loop exit
PB: predicated region body
PF: predicated region fallthrough
CT: control target
= control target key end

     0   :  { %s2715_s0 = inlined_call_operand.hbm [shape: bf16[32,32], index: 0, kind: input, shape index: {}]   ;;  %s2716_s1 = inlined_call_operand.hbm [shape: bf16[32,32], index: 1, kind: input, shape index: {}]   ;;  %s2717_s2 = inlined_call_operand.hbm [shape: bf16[32,256], index: 2, kind: input, shape index: {}]   ;;  %s2718_s3 = inlined_call_operand.hbm [shape: bf16[32,256], index: 3, kind: input, shape index: {}]   ;;  %s2719_s4 = inlined_call_operand.hbm [shape: s32[32,1], index: 4, kind: input, shape index: {}]   ;;  %s2720_s5 = inlined_call_operand.hbm [shape: f32[32,1], index: 5, kind: input, shape index: {}]   ;;  %s2721_s6 = inlined_call_operand.hbm [shape: f32[32,256], index: 6, kind: output, shape index: {0}]   ;;  %s2722_s7 = inlined_call_operand.hbm [shape: f32[1,1], index: 7, kind: output, shape index: {1}]   ;;  %s2723_s8 = inlined_call_operand.hbm [shape: f32[1,1], index: 8, kind: output, shape index: {2}]  }
   0x1   :  { %2763 = sst [smem:[#allocation53_spill]] %s2716_s1 }
   0x2   :  { %2764 = sst [smem:[#allocation54_spill]] %s2718_s3 }
   0x3   :  { %2765 = sst [smem:[#allocation55_spill]] %s2720_s5 }
   0x4   :  { %2766 = sst [smem:[#allocation56_spill]] %s2721_s6 }
   0x5   :  { %2767 = sst [smem:[#allocation57_spill]] %s2722_s7 }
   0x6   :  { %2768 = sst [smem:[#allocation58_spill]] %s2723_s8 }
   0x7   :  { %14 = vsyncpa [#allocation11], 0 }
   0x8   :  { %16 = vsyncpa [#allocation11 + $0x1], 0 }
   0x9   :  { %17 = vsyncpa [#allocation15], 0 }
   0xa   :  { %19 = vsyncpa [#allocation15 + $0x1], 0 }
   0xb   :  { %20 = vsyncpa [#allocation18], 0 }
   0xc   :  { %22 = vsyncpa [#allocation18 + $0x1], 0 }
   0xd   :  { %23 = vsyncpa [#allocation21], 0 }
   0xe   :  { %25 = vsyncpa [#allocation21 + $0x1], 0 }
   0xf   :  { %26 = vsyncpa [#allocation12], 0 }
  0x10   :  { %28 = vsyncpa [#allocation12 + $0x1], 0 }
  0x11   :  { %29 = vsyncpa [#allocation13], 0 }
  0x12   :  { %30 = vsyncpa [#allocation25], 0  ;;  %s2006_s27 = smov 0   ;;  %s2008_s28 = smov 0  }
  0x13   :  { %s2010_s29 = smov 0   ;;  %s2012_s30 = smov 0  }
  0x14   :  { %s2014_s9 = smov 0   ;;  %s2016_s10 = smov 0  }
  0x15   :  { %s2018_s11 = smov 0   ;;  %s2020_s12 = smov 0  }
  0x16   :  { %s2022_s13 = smov 0   ;;  %s2024_s14 = smov 0  }
  0x17   :  { %s2026_s15 = smov 0   ;;  %s2028_s16 = smov 0  }
  0x18   :  { %s2030_s17 = smov 0   ;;  %s2032_s18 = smov 0  }
  0x19 LB: > { %2769 = sst [smem:[#allocation35_spill]] %s1892_s29  ;;  %s2075_s19 = sadd.s32 4294967295, %s1936_s18   ;;  %s1936_s18 = sphi %s2032_s18, %s36_s18   ;;  %s1932_s17 = sphi %s2030_s17, %s2865_s17   ;;  %s1928_s16 = sphi %s2028_s16, %s2858_s16   ;;  %s1924_s15 = sphi %s2026_s15, %s2864_s15   ;;  %s1920_s14 = sphi %s2024_s14, %s2857_s14   ;;  %s1916_s13 = sphi %s2022_s13, %s2856_s13   ;;  %s1912_s12 = sphi %s2020_s12, %s2855_s12   ;;  %s1908_s11 = sphi %s2018_s11, %s2854_s11   ;;  %s1904_s10 = sphi %s2016_s10, %s2853_s10   ;;  %s1900_s9 = sphi %s2014_s9, %s2852_s9   ;;  %s1896_s30 = sphi %s2012_s30, %s2851_s30   ;;  %s1892_s29 = sphi %s2010_s29, %s2863_s29   ;;  %s1888_s28 = sphi %s2008_s28, %s2862_s28   ;;  %s1884_s27 = sphi %s2006_s27, %s2861_s27  }
  0x1a   : > { %2770 = sst [smem:[#allocation36_spill]] %s1900_s9  ;;  %p62_p0 = scmp.ne.s32.totalorder %s1916_s13, %s1912_s12 }
  0x1b   : > { %2771 = sst [smem:[#allocation37_spill]] %s1904_s10  ;;  %p2736_p1 = scmp.eq.s32.totalorder %s1936_s18, 0 }
  0x1c   : > { %2772 = sst [smem:[#allocation38_spill]] %s1912_s12  ;;  %p68_p2 = scmp.ne.s32.totalorder %s1912_s12, %s1908_s11 }
  0x1d   : > { %2773 = sst [smem:[#allocation39_spill]] %s1916_s13  ;;  %p2735_p3 = scmp.eq.s32.totalorder %s2075_s19, 0 }
  0x1e   : > { %2774 = sst [smem:[#allocation40_spill]] %s1920_s14  ;;  %p64_p5 = por %p2736_p1, %p62_p0 }
  0x1f   : > { %2775 = sst [smem:[#allocation41_spill]] %s1924_s15  ;;  %p2089_p6 = por %p2735_p3, %p68_p2 }
  0x20   : > { %2776 = sst [smem:[#allocation42_spill]] %s1928_s16  ;;  %p2733_p7 = scmp.lt.s32.totalorder %s1936_s18, 4 }
  0x21   : > { %2777 = sst [smem:[#allocation43_spill]] %s2075_s19  ;;  %s2095_s23 = sand.u32 1, %s1916_s13  }
  0x22   : > { %s2778_s22 = scalar_select %p2089_p6, 1, 0 }
  0x23   : > { %s2732_s24 = sshll.u32 %s1932_s17, 7  ;;  %s2731_s25 = sshll.u32 %s2095_s23, 3 }
  0x24   : > { %2779 = sst [smem:[#allocation44_spill]] %s2778_s22  ;;  %p2101_p8 = pnand %p2733_p7, %p64_p5 }
  0x25   : > { %s2734_s11 = sand.u32 1, %s1936_s18   ;;  %s2781_s1 = sld [smem:[#allocation53_spill]] }
  0x26   : > { %s2780_s26 = scalar_select %p2101_p8, 1, 0 }
  0x27   : > { %s317_s7 = scalar_lea.vmem [#allocation14], %s2731_s25  ;;  %s2119_s14 = scalar_lea.sflag [#allocation15], %s2734_s11 }
  0x28   : > { %s324_s6 = sshll.u32 %s317_s7, 4  ;;  %p2125_p10 = pneg %p2101_p8  ;;  %s2115_s6 = int_to_ptr.vmem [resolvable:$true] %s324_s6 }
  0x2b   : > { %s2111_s8 = scalar_lea.hbm %s2781_s1, %s2732_s24  ;;  %s1563_s7 = scalar_lea.hbm %s2781_s1, 256 }
  0x2c   : > { %s1558_s15 = scalar_lea.hbm %s2111_s8, 128  ;;  %p1564_p13 = scmp.lt.u32.totalorder %s2111_s8, %s2781_s1 }
  0x2d   : > { %p1559_p9 = scmp.ne.s32.totalorder %s2111_s8, %s1558_s15  ;;  %p1565_p0 = scmp.lt.u32.totalorder %s1563_s7, %s1558_s15 }
  0x2e   : > { %p1567_p5 = scmp.lt.u32.totalorder %s1558_s15, %s2111_s8 }
  0x2f   : > { %p1561_p11 = pnand %p2125_p10, %p1559_p9  ;;  %p1566_p2 = por %p1565_p0, %p1564_p13 }
  0x31   : > { %p1562_p12 = pneg %p1561_p11  ;;  %p1568_p7 = por %p1567_p5, %p1566_p2 }
  0x33   : > { %p1569_p4 = pnand %p1568_p7, %p1562_p12 }
  0x35   : > { %1572 = shalt.err (!%p1569_p4)
}
  0x36   : > { %s1573_s11 = scalar_lea.vmem %s2115_s6, 128  ;;  %s1938_s20 = smov [#allocation14]  }
  0x37   : > { %p1574_p9 = scmp.ne.s32.totalorder %s2115_s6, %s1573_s11  ;;  %s1578_s21 = sshll.u32 %s1938_s20, 4  ;;  %s1579_s21 = int_to_ptr.vmem [resolvable:$false] %s1578_s21 }
  0x38   : > { %s1580_s24 = scalar_lea.vmem %s1579_s21, 256  ;;  %p1581_p1 = scmp.lt.s32.totalorder %s2115_s6, %s1579_s21 }
  0x39   : > { %p1576_p11 = pnand %p1574_p9, %p2125_p10  ;;  %p1582_p6 = scmp.lt.s32.totalorder %s1580_s24, %s1573_s11 }
  0x3b   : > { %p1577_p3 = pneg %p1576_p11  ;;  %p1583_p13 = por %p1582_p6, %p1581_p1 }
  0x3d   : > { %p1584_p0 = pnand %p1583_p13, %p1577_p3 }
  0x3f   : > { %1587 = shalt.err (!%p1584_p0)
}
  0x40   : > { %s2738_s15 = smov 64   ;;  %s2740_s25 = smov 4  }
  0x41   : > { %1357 = dma.hbm_to_vmem [thread:$0]  (!%p2101_p8), %s2111_s8, 128, %s2115_s6, %s2119_s14, %s2738_s15, %s2738_s15, %s2740_s25  }
  0x42   : > { %p1257_p1 = scmp.ge.s32.totalorder %s1936_s18, 1  ;;  %p414_p3 = scmp.lt.s32.totalorder %s1936_s18, 5 }
  0x43   : > { %s1238_s7 = sadd.s32 4294967294, %s1936_s18   ;;  %s45_s20 = sadd.s32 1, %s1928_s16 }
  0x44   : > { %p2154_p4 = pnand %p1257_p1, %p414_p3  ;;  %s107_s21 = sadd.s32 1, %s1904_s10 }
  0x45   : > { %p46_p6 = scmp.ge.s32.totalorder %s45_s20, 2  ;;  %p114_p7 = scmp.ne.s32.totalorder %s1904_s10, %s1900_s9 }
  0x46   : > { %s2783_s11 = scalar_select %p2154_p4, 1, 0 }
  0x47   : > { %p120_p12 = scmp.ne.s32.totalorder %s1900_s9, %s1896_s30  ;;  %s213_s24 = sadd.s32 1, %s1892_s29 }
  0x48   : > { %2784 = sst [smem:[#allocation45_spill]] %s2783_s11  ;;  %s2867_s20 = smov (%p46_p6, %s45_s20), 0 }
  0x49   : > { %2785 = sst [smem:[#allocation46_spill]] %s2867_s20  ;;  %s2786_s6 = sadd.s32 1, %s1932_s17 }
  0x4a   : > { %s2869_s6 = smov (!%p46_p6, %s2786_s6), %s1932_s17  ;;  %s104_s8 = ssub.s32 %s1928_s16, %s2867_s20 }
  0x4b   : > { %p2787_p2 = scmp.eq.s32.totalorder %s1936_s18, 0  ;;  %p50_p9 = scmp.ge.s32.totalorder %s2869_s6, 2 }
  0x4c   : > { %p105_p11 = scmp.eq.s32.totalorder %s104_s8, 0  ;;  %p2789_p13 = scmp.eq.s32.totalorder %s2075_s19, 0 }
  0x4d   : > { %p2175_p5 = por %p114_p7, %p2787_p2  ;;  %p223_p1 = scmp.ne.s32.totalorder %s1892_s29, %s1888_s28 }
  0x4e   : > { %p2181_p0 = por %p120_p12, %p2789_p13  ;;  %s2871_s6 = smov (%p50_p9, %s2869_s6), 0 }
  0x4f   : > { %2792 = sst [smem:[#allocation48_spill]] %s2871_s6  ;;  %s52_s1 = ssub.s32 %s1932_s17, %s2871_s6 }
  0x50   : > { %s2790_s30 = scalar_select %p2181_p0, 1, 0 }
  0x51   : > { %s2190_s25 = scalar_select %p105_p11, %s1904_s10, %s107_s21  }
  0x52   : > { %2791 = sst [smem:[#allocation47_spill]] %s2790_s30  ;;  %p2794_p3 = scmp.eq.s32.totalorder %s2075_s19, 3 }
  0x53   : > { %2793 = sst [smem:[#allocation49_spill]] %s2190_s25  ;;  %p53_p7 = scmp.eq.s32.totalorder %s52_s1, 0 }
  0x54   : > { %p2196_p6 = por %p2794_p3, %p223_p1  ;;  %s210_s9 = sor.u32 %s104_s8, %s52_s1 }
  0x55   : > { %p211_p12 = scmp.eq.s32.totalorder %s210_s9, 0  ;;  %p229_p2 = scmp.ne.s32.totalorder %s1888_s28, %s1884_s27 }
  0x56   : > { %s2795_s20 = scalar_select %p2196_p6, 1, 0 }
  0x57   : > { %s2797_s12 = sadd.s32 1, %s1916_s13  ;;  %p230_p9 = scmp.eq.s32.totalorder %s1238_s7, 3 }
  0x58   : > { %2796 = sst [smem:[#allocation50_spill]] %s2795_s20  ;;  %s336_s21 = sand.u32 1, %s1904_s10  }
  0x59   : > { %s2205_s30 = scalar_select %p53_p7, %s1916_s13, %s2797_s12  }
  0x5a   : > { %s2208_s11 = scalar_select %p211_p12, %s1892_s29, %s213_s24  }
  0x5b   : > { %2798 = sst [smem:[#allocation51_spill]] %s2205_s30  ;;  %s1247_s6 = sshll.u32 %s336_s21, 4 }
  0x5c   : > { %2799 = sst [smem:[#allocation52_spill]] %s2208_s11  ;;  %s1248_s25 = sshll.u32 %s1928_s16, 6 }
  0x5d   : > { %p2212_p11 = por %p230_p9, %p229_p2  ;;  %s2219_s1 = scalar_lea.hbm %s2717_s2, %s1248_s25 }
  0x5e   : > { %s338_s9 = scalar_lea.vmem [#allocation16], %s1247_s6  ;;  %p2801_p13 = scmp.lt.s32.totalorder %s1936_s18, 4 }
  0x5f   : > { %s2800_s19 = scalar_select %p2212_p11, 1, 0 }
  0x60   : > { %s344_s8 = sshll.u32 %s338_s9, 4  ;;  %p2227_p1 = pnand %p2801_p13, %p2175_p5  ;;  %s2221_s8 = int_to_ptr.vmem [resolvable:$true] %s344_s8 }
  0x61   : > { %s2803_s3 = sld [smem:[#allocation54_spill]]  ;;  %s358_s5 = scalar_lea.vmem [#allocation17], %s1247_s6 }
  0x62   : > { %s364_s20 = sshll.u32 %s358_s5, 4  ;;  %s2804_s15 = sand.u32 1, %s1936_s18   ;;  %s2236_s20 = int_to_ptr.vmem [resolvable:$true] %s364_s20 }
  0x63   : > { %s2240_s9 = scalar_lea.sflag [#allocation18], %s2804_s15  ;;  %p2762_p3 = pneg %p2227_p1 }
  0x67   : > { %s2234_s21 = scalar_lea.hbm %s2803_s3, %s1248_s25  ;;  %s1593_s24 = scalar_lea.hbm %s2803_s3, 512 }
  0x68   : > { %s1588_s16 = scalar_lea.hbm %s2234_s21, 256  ;;  %p1594_p2 = scmp.lt.u32.totalorder %s2234_s21, %s2803_s3 }
  0x69   : > { %p1589_p5 = scmp.ne.s32.totalorder %s2234_s21, %s1588_s16  ;;  %p1595_p9 = scmp.lt.u32.totalorder %s1593_s24, %s1588_s16 }
  0x6a   : > { %p1597_p11 = scmp.lt.u32.totalorder %s1588_s16, %s2234_s21 }
  0x6b   : > { %p1591_p7 = pnand %p2762_p3, %p1589_p5  ;;  %p1596_p13 = por %p1595_p9, %p1594_p2 }
  0x6d   : > { %p1592_p12 = pneg %p1591_p7  ;;  %p1598_p6 = por %p1597_p11, %p1596_p13 }
  0x6f   : > { %p1599_p0 = pnand %p1598_p6, %p1592_p12 }
  0x71   : > { %1602 = shalt.err (!%p1599_p0)
}
  0x72   : > { %s1603_s5 = scalar_lea.vmem %s2236_s20, 256  ;;  %s1941_s15 = smov [#allocation17]  }
  0x73   : > { %p1604_p5 = scmp.ne.s32.totalorder %s2236_s20, %s1603_s5  ;;  %s1608_s25 = sshll.u32 %s1941_s15, 4  ;;  %s1609_s25 = int_to_ptr.vmem [resolvable:$false] %s1608_s25 }
  0x74   : > { %s1610_s30 = scalar_lea.vmem %s1609_s25, 512  ;;  %p1611_p8 = scmp.lt.s32.totalorder %s2236_s20, %s1609_s25 }
  0x75   : > { %p1606_p7 = pnand %p1604_p5, %p2762_p3  ;;  %p1612_p2 = scmp.lt.s32.totalorder %s1610_s30, %s1603_s5 }
  0x77   : > { %p1607_p4 = pneg %p1606_p7  ;;  %p1613_p9 = por %p1612_p2, %p1611_p8 }
  0x79   : > { %p1614_p11 = pnand %p1613_p9, %p1607_p4 }
  0x7b   : > { %1617 = shalt.err (!%p1614_p11)
}
  0x7c   : > { %s1942_s16 = smov 128   ;;  %s2805_s7 = smov 4  }
  0x7d   : > { %s2806_s24 = smov 64   ;;  %s2807_s6 = sshll.u32 %s1932_s17, 7 }
  0x7e   : > { %1363 = dma.hbm_to_vmem [thread:$0]  (!%p2227_p1), %s2234_s21, 256, %s2236_s20, %s2240_s9, %s1942_s16, %s2806_s24, %s2805_s7  }
  0x7f   : > { %s2276_s25 = scalar_lea.hbm %s2715_s0, %s2807_s6  ;;  %s2808_s30 = sshll.u32 %s2095_s23, 3 }
  0x80   : > { %s296_s3 = scalar_lea.vmem [#allocation10], %s2808_s30  ;;  %s1251_s10 = sshll.u32 %s2095_s23, 4 }
  0x81   : > { %s303_s13 = sshll.u32 %s296_s3, 4  ;;  %s293_s11 = scalar_lea.sflag [#allocation11], %s2095_s23  ;;  %s2280_s13 = int_to_ptr.vmem [resolvable:$true] %s303_s13 }
  0x82   : > { %s1618_s29 = scalar_lea.hbm %s2276_s25, 128  ;;  %s1623_s6 = scalar_lea.hbm %s2715_s0, 256 }
  0x83   : > { %p1619_p8 = scmp.ne.s32.totalorder %s2276_s25, %s1618_s29  ;;  %p1624_p6 = scmp.lt.u32.totalorder %s2276_s25, %s2715_s0 }
  0x84   : > { %p1625_p12 = scmp.lt.u32.totalorder %s1623_s6, %s1618_s29  ;;  %p1627_p5 = scmp.lt.u32.totalorder %s1618_s29, %s2276_s25 }
  0x85   : > { %p1621_p4 = pnand %p1619_p8, %p2125_p10 }
  0x86   : > { %p1626_p13 = por %p1625_p12, %p1624_p6 }
  0x87   : > { %p1622_p0 = pneg %p1621_p4 }
  0x88   : > { %p1628_p7 = por %p1627_p5, %p1626_p13 }
  0x8a   : > { %p1629_p2 = pnand %p1628_p7, %p1622_p0 }
  0x8c   : > { %1632 = shalt.err (!%p1629_p2)
}
  0x8d   : > { %s1633_s3 = scalar_lea.vmem %s2280_s13, 128  ;;  %s1943_s30 = smov [#allocation10]  }
  0x8e   : > { %p1634_p9 = scmp.ne.s32.totalorder %s2280_s13, %s1633_s3  ;;  %s1638_s21 = sshll.u32 %s1943_s30, 4  ;;  %s1639_s21 = int_to_ptr.vmem [resolvable:$false] %s1638_s21 }
  0x8f   : > { %s1640_s20 = scalar_lea.vmem %s1639_s21, 256  ;;  %p1641_p4 = scmp.lt.s32.totalorder %s2280_s13, %s1639_s21 }
  0x90   : > { %p1636_p11 = pnand %p1634_p9, %p2125_p10  ;;  %p1642_p3 = scmp.lt.s32.totalorder %s1640_s20, %s1633_s3 }
  0x92   : > { %p1637_p8 = pneg %p1636_p11  ;;  %p1643_p6 = por %p1642_p3, %p1641_p4 }
  0x94   : > { %p1644_p12 = pnand %p1643_p6, %p1637_p8 }
  0x96   : > { %1647 = shalt.err (!%p1644_p12)
}
  0x97   : > { %p2809_p0 = scmp.ne.s32.totalorder %s2780_s26, 0  ;;  %s1648_s29 = scalar_lea.hbm %s2219_s1, 256 }
  0x98   : > { %p1649_p13 = scmp.ne.s32.totalorder %s2219_s1, %s1648_s29  ;;  %p2810_p3 = pneg %p2227_p1 }
  0x99   : > { %1354 = dma.hbm_to_vmem [thread:$0]  (!%p2809_p0), %s2276_s25, 128, %s2280_s13, %s293_s11, %s2806_s24, %s2806_s24, %s2805_s7  }
  0x9a   : > { %p1651_p5 = pnand %p1649_p13, %p2810_p3  ;;  %s1653_s15 = scalar_lea.hbm %s2717_s2, 512 }
  0x9b   : > { %p1654_p2 = scmp.lt.u32.totalorder %s2219_s1, %s2717_s2  ;;  %p1655_p9 = scmp.lt.u32.totalorder %s1653_s15, %s1648_s29 }
  0x9c   : > { %p1652_p7 = pneg %p1651_p5  ;;  %p1657_p8 = scmp.lt.u32.totalorder %s1648_s29, %s2219_s1 }
  0x9d   : > { %p1656_p11 = por %p1655_p9, %p1654_p2 }
  0x9f   : > { %p1658_p4 = por %p1657_p8, %p1656_p11 }
  0xa1   : > { %p1659_p6 = pnand %p1658_p4, %p1652_p7 }
  0xa3   : > { %1662 = shalt.err (!%p1659_p6)
}
  0xa4   : > { %s1663_s13 = scalar_lea.vmem %s2221_s8, 256  ;;  %p2811_p13 = pmov %p2810_p3 }
  0xa5   : > { %p1664_p12 = scmp.ne.s32.totalorder %s2221_s8, %s1663_s13  ;;  %s1944_s11 = smov [#allocation16]  }
  0xa6   : > { %s1668_s25 = sshll.u32 %s1944_s11, 4  ;;  %s1669_s25 = int_to_ptr.vmem [resolvable:$false] %s1668_s25 }
  0xa7   : > { %p1666_p3 = pnand %p1664_p12, %p2811_p13  ;;  %s1670_s21 = scalar_lea.vmem %s1669_s25, 512 }
  0xa8   : > { %p1671_p0 = scmp.lt.s32.totalorder %s2221_s8, %s1669_s25  ;;  %p1672_p2 = scmp.lt.s32.totalorder %s1670_s21, %s1663_s13 }
  0xa9   : > { %p1667_p5 = pneg %p1666_p3 }
  0xaa   : > { %p1673_p9 = por %p1672_p2, %p1671_p0 }
  0xac   : > { %p1674_p11 = pnand %p1673_p9, %p1667_p5 }
  0xae   : > { %1677 = shalt.err (!%p1674_p11)
}
  0xaf   : > { %1360 = dma.hbm_to_vmem [thread:$0]  (!%p2227_p1), %s2219_s1, 256, %s2221_s8, %s2119_s14, %s1942_s16, %s2806_s24, %s2805_s7  }
  0xb0   : > { %s1292_s20 = sshll.u32 %s1932_s17, 8  ;;  %s378_s12 = scalar_lea.vmem [#allocation19], %s1251_s10 }
  0xb1   : > { %s2343_s5 = scalar_lea.hbm %s2719_s4, %s1292_s20  ;;  %s385_s15 = sshll.u32 %s378_s12, 4  ;;  %s2347_s15 = int_to_ptr.vmem [resolvable:$true] %s385_s15 }
  0xb2   : > { %s1678_s3 = scalar_lea.hbm %s2343_s5, 256  ;;  %s1683_s8 = scalar_lea.hbm %s2719_s4, 512 }
  0xb3   : > { %p1679_p0 = scmp.ne.s32.totalorder %s2343_s5, %s1678_s3  ;;  %p1684_p8 = scmp.lt.u32.totalorder %s2343_s5, %s2719_s4 }
  0xb4   : > { %p1685_p4 = scmp.lt.u32.totalorder %s1683_s8, %s1678_s3  ;;  %p1687_p12 = scmp.lt.u32.totalorder %s1678_s3, %s2343_s5 }
  0xb5   : > { %p1681_p1 = pnand %p1679_p0, %p2125_p10 }
  0xb6   : > { %p1686_p6 = por %p1685_p4, %p1684_p8 }
  0xb7   : > { %p1682_p7 = pneg %p1681_p1 }
  0xb8   : > { %p1688_p13 = por %p1687_p12, %p1686_p6 }
  0xba   : > { %p1689_p3 = pnand %p1688_p13, %p1682_p7 }
  0xbc   : > { %1692 = shalt.err (!%p1689_p3)
}
  0xbd   : > { %s1693_s30 = scalar_lea.vmem %s2347_s15, 256  ;;  %s1945_s13 = smov [#allocation19]  }
  0xbe   : > { %p1694_p5 = scmp.ne.s32.totalorder %s2347_s15, %s1693_s30  ;;  %s1698_s11 = sshll.u32 %s1945_s13, 4  ;;  %s1699_s11 = int_to_ptr.vmem [resolvable:$false] %s1698_s11 }
  0xbf   : > { %s1700_s25 = scalar_lea.vmem %s1699_s11, 512  ;;  %p1701_p11 = scmp.lt.s32.totalorder %s2347_s15, %s1699_s11 }
  0xc0   : > { %p1696_p2 = pnand %p1694_p5, %p2125_p10  ;;  %p1702_p0 = scmp.lt.s32.totalorder %s1700_s25, %s1693_s30 }
  0xc2   : > { %p1697_p9 = pneg %p1696_p2  ;;  %p1703_p1 = por %p1702_p0, %p1701_p11 }
  0xc4   : > { %p1704_p8 = pnand %p1703_p1, %p1697_p9 }
  0xc6   : > { %1707 = shalt.err (!%p1704_p8)
}
  0xc7   : > { %s1946_s21 = smov 8   ;;  %p2812_p7 = scmp.ne.s32.totalorder %s2780_s26, 0 }
  0xc8   : > { %s2813_s12 = sld [smem:[#allocation55_spill]]  ;;  %s399_s1 = scalar_lea.vmem [#allocation20], %s1251_s10 }
  0xc9   : > { %1366 = dma.hbm_to_vmem [thread:$0]  (!%p2812_p7), %s2343_s5, 256, %s2347_s15, %s2240_s9, %s1942_s16, %s1942_s16, %s1946_s21  }
  0xca   : > { %s406_s8 = sshll.u32 %s399_s1, 4  ;;  %s396_s7 = scalar_lea.sflag [#allocation21], %s2095_s23  ;;  %s2383_s8 = int_to_ptr.vmem [resolvable:$true] %s406_s8 }
  0xce   : > { %s2814_s3 = smov %s2813_s12  ;;  %s2379_s14 = scalar_lea.hbm %s2813_s12, %s1292_s20 }
  0xcf   : > { %s1708_s24 = scalar_lea.hbm %s2379_s14, 256  ;;  %s1713_s20 = scalar_lea.hbm %s2814_s3, 512 }
  0xd0   : > { %p1709_p4 = scmp.ne.s32.totalorder %s2379_s14, %s1708_s24  ;;  %p1714_p13 = scmp.lt.u32.totalorder %s2379_s14, %s2814_s3 }
  0xd1   : > { %p1715_p3 = scmp.lt.u32.totalorder %s1713_s20, %s1708_s24  ;;  %p1717_p2 = scmp.lt.u32.totalorder %s1708_s24, %s2379_s14 }
  0xd2   : > { %p1711_p6 = pnand %p1709_p4, %p2125_p10 }
  0xd3   : > { %p1716_p5 = por %p1715_p3, %p1714_p13 }
  0xd4   : > { %p1712_p12 = pneg %p1711_p6 }
  0xd5   : > { %p1718_p9 = por %p1717_p2, %p1716_p5 }
  0xd7   : > { %p1719_p11 = pnand %p1718_p9, %p1712_p12 }
  0xd9   : > { %1722 = shalt.err (!%p1719_p11)
}
  0xda   : > { %s1723_s10 = scalar_lea.vmem %s2383_s8, 256  ;;  %s1947_s13 = smov [#allocation20]  }
  0xdb   : > { %p1724_p0 = scmp.ne.s32.totalorder %s2383_s8, %s1723_s10  ;;  %s1728_s11 = sshll.u32 %s1947_s13, 4  ;;  %s1729_s11 = int_to_ptr.vmem [resolvable:$false] %s1728_s11 }
  0xdc   : > { %s1730_s25 = scalar_lea.vmem %s1729_s11, 512  ;;  %p1731_p4 = scmp.lt.s32.totalorder %s2383_s8, %s1729_s11 }
  0xdd   : > { %p1726_p1 = pnand %p1724_p0, %p2125_p10  ;;  %p1732_p6 = scmp.lt.s32.totalorder %s1730_s25, %s1723_s10 }
  0xdf   : > { %p1727_p8 = pneg %p1726_p1  ;;  %p1733_p13 = por %p1732_p6, %p1731_p4 }
  0xe1   : > { %p1734_p3 = pnand %p1733_p13, %p1727_p8 }
  0xe3   : > { %1737 = shalt.err (!%p1734_p3)
}
  0xe4   : > { %1369 = dma.hbm_to_vmem [thread:$0]  (!%p2812_p7), %s2379_s14, 256, %s2383_s8, %s396_s7, %s1942_s16, %s1942_s16, %s1946_s21  }
  0xe5   : > { %s2815_s22 = sld [smem:[#allocation45_spill]] }
  0xeb   : > { %p2816_p10 = scmp.ne.s32.totalorder %s2815_s22, 0 }
  0xec   : > { %s2817_s29 = sld [smem:[#allocation38_spill]] (!%p2816_p10)  ;;  %s2818_s6 = sld [smem:[#allocation44_spill]] (!%p2816_p10) }
  0xed   : > { %418 = sbr.rel (%p2816_p10) target bundleno = 1355 (0x54b), region = 44 }
  0xf2   : > { %s420_s12 = sand.u32 (!%p2816_p10), 1, %s2817_s29   ;;  %p2819_p12 = scmp.ne.s32.totalorder (!%p2816_p10), %s2818_s6, 0 }
  0xf3   : > { %s1258_s1 = sshll.u32 (!%p2816_p10), %s420_s12, 3  ;;  %s421_s24 = scalar_lea.sflag (!%p2816_p10), [#allocation11], %s420_s12 }
  0xf4   : > { %s2415_s9 = scalar_lea.vmem [#allocation10], %s1258_s1 }
  0xf5   : > { %1847 = dma.done.wait (%p2819_p12), %s421_s24, 128  }
  0xf6   : > { %1849 = vsyncadd (%p2819_p12), %s421_s24, 4294967168  ;;  %s2820_s26 = sld [smem:[#allocation43_spill]]  ;;  %s2422_s16 = scalar_lea.vmem [#allocation14], %s1258_s1 }
  0xfc   : > { %s429_s23 = sand.u32 1, %s2820_s26  }
  0xfd   : > { %s430_s5 = scalar_lea.sflag [#allocation15], %s429_s23 }
  0xfe   : > { %1851 = dma.done.wait (%p2819_p12), %s430_s5, 128  }
  0xff   : > { %1853 = vsyncadd (%p2819_p12), %s430_s5, 4294967168  ;;  %s2821_s21 = sld [smem:[#allocation36_spill]]  ;;  %s2822_s14 = sld [smem:[#allocation47_spill]] }
 0x105   : > { %s440_s8 = sand.u32 1, %s2821_s21   ;;  %p2823_p7 = scmp.ne.s32.totalorder %s2822_s14, 0 }
 0x106   : > { %s2429_s7 = sshll.u32 %s440_s8, 4 }
 0x107   : > { %s442_s20 = scalar_lea.vmem [#allocation16], %s2429_s7 }
 0x108   : > { %1855 = dma.done.wait (%p2823_p7), %s430_s5, 256  }
 0x109   : > { %1857 = vsyncadd (%p2823_p7), %s430_s5, 4294967040  ;;  %s448_s15 = scalar_lea.sflag [#allocation18], %s429_s23  ;;  %s451_s30 = scalar_lea.vmem [#allocation17], %s2429_s7 }
 0x10a   : > { %1859 = dma.done.wait (%p2823_p7), %s448_s15, 256  }
 0x10b   : > { %1861 = vsyncadd (%p2823_p7), %s448_s15, 4294967040  ;;  %s1262_s10 = sshll.u32 %s420_s12, 4 }
 0x10c   : > { %s2441_s13 = scalar_lea.vmem [#allocation19], %s1262_s10 }
 0x10d   : > { %1863 = dma.done.wait (%p2819_p12), %s448_s15, 256  }
 0x10e   : > { %1865 = vsyncadd (%p2819_p12), %s448_s15, 4294967040  ;;  %s466_s11 = scalar_lea.sflag [#allocation21], %s420_s12  ;;  %s2447_s25 = scalar_lea.vmem [#allocation20], %s1262_s10 }
 0x10f   : > { %1867 = dma.done.wait (%p2819_p12), %s466_s11, 256  }
 0x110   : > { %1869 = vsyncadd (%p2819_p12), %s466_s11, 4294967040  ;;  %s2824_s22 = sld [smem:[#allocation41_spill]]  ;;  %s2825_s29 = sld [smem:[#allocation40_spill]] }
 0x111   : > { %s520_s1 = sand.u32 1, %s1888_s28   ;;  %s1948_s26 = smov 0.0  }
 0x112   : > { %s1264_s24 = sshll.u32 %s520_s1, 4 }
 0x113   : > { %s2458_s12 = scalar_lea.vmem [#allocation22], %s1264_s24 }
 0x116   : > { %p533_p5 = scmp.eq.s32.totalorder %s2824_s22, 0  ;;  %p534_p2 = scmp.eq.s32.totalorder %s2825_s29, 0 }
 0x117   : > { %p1265_p11 = scmp.ne.s32.totalorder %s2825_s29, 0 }
 0x118   : > { %p535_p9 = pnand %p534_p2, %p533_p5  ;;  %vm548_vm0 = vcmask (!%p1265_p11), 7168   ;;  %v1949_v0 = vmov (!%p1265_p11), -inf   ;;  %v1950_v1 = vmov (!%p1265_p11), 0.0  }
 0x119   : > { %547 = sbr.rel (%p1265_p11) target bundleno = 288 (0x120), region = 76  ;;  %549 = vst.msk [vmem:[#allocation3] sm:$0xff] (!%p1265_p11), %vm548_vm0, %v1949_v0  ;;  %550 = vst.msk [vmem:[#allocation3 + $0x8] sm:$0xff] (!%p1265_p11), %vm548_vm0, %v1949_v0 }
 0x11a   : > { %1338 = sst [smem:[#allocation2]] (!%p535_p9), %s1948_s26  ;;  %551 = vst.msk [vmem:[#allocation4] sm:$0xff] (!%p1265_p11), %vm548_vm0, %v1949_v0  ;;  %552 = vst.msk [vmem:[#allocation4 + $0x8] sm:$0xff] (!%p1265_p11), %vm548_vm0, %v1949_v0 }
 0x11b   : > { %1339 = sst [smem:[#allocation2 + $0x1]] (!%p535_p9), %s1948_s26  ;;  %553 = vst.msk [vmem:[#allocation5] sm:$0xff] (!%p1265_p11), %vm548_vm0, %v1950_v1  ;;  %554 = vst.msk [vmem:[#allocation5 + $0x8] sm:$0xff] (!%p1265_p11), %vm548_vm0, %v1950_v1 }
 0x11c   : > { %1340 = sst [smem:[#allocation2 + $0x2]] (!%p535_p9), %s1948_s26  ;;  %555 = vst.msk [vmem:[#allocation6] sm:$0xff] (!%p1265_p11), %vm548_vm0, %v1950_v1  ;;  %556 = vst.msk [vmem:[#allocation6 + $0x8] sm:$0xff] (!%p1265_p11), %vm548_vm0, %v1950_v1 }
 0x11d   : > { %557 = vst.msk [vmem:[#allocation7] sm:$0xff] (!%p1265_p11), %vm548_vm0, %v1950_v1  ;;  %558 = vst.msk [vmem:[#allocation7 + $0x8] sm:$0xff] (!%p1265_p11), %vm548_vm0, %v1950_v1 }
 0x11e   : > { %559 = vst.msk [vmem:[#allocation8] sm:$0xff] (!%p1265_p11), %vm548_vm0, %v1950_v1  ;;  %560 = vst.msk [vmem:[#allocation8 + $0x8] sm:$0xff] (!%p1265_p11), %vm548_vm0, %v1950_v1 }
 0x11f   : > { %561 = vst.msk [vmem:[#allocation9] sm:$0xff] (!%p1265_p11), %vm548_vm0, %v1950_v1  ;;  %562 = vst.msk [vmem:[#allocation9 + $0x8] sm:$0xff] (!%p1265_p11), %vm548_vm0, %v1950_v1 }
 0x120 PF: > { %v1510_v2 = vld [vmem:[%s442_s20] sm:$0xff]   ;;  %v1951_v3 = vmov 0.0   ;;  %v1512_v5 = vld [vmem:[%s442_s20 + $0x8] sm:$0xff]   ;;  %vm1952_vm1 = vmmov 0   ;;  %vm586_vm2 = vcmask 261120   ;;  %v1953_v19 = vmov 0  }
 0x121   : > { %1301 = vmatprep.subr.bf16.mxu0 %v1951_v3  ;;  %1309 = vmatprep.subr.bf16.mxu1 %v1951_v3  ;;  %v1511_v4 = vld [vmem:[%s451_s30] sm:$0xff]   ;;  %v1513_v6 = vld [vmem:[%s451_s30 + $0x8] sm:$0xff]   ;;  %vm658_vm3 = vcmask 7168   ;;  %s2826_s6 = sld [smem:[#allocation40_spill]]  ;;  %v633_v42 = vlaneseq }
 0x122   : > { %1302 = vmatpush3.bf16.msra.mxu0 %v1510_v2  ;;  %1305 = vmatprep.mubr.msk.bf16.mxu0 %vm1952_vm1, %v1951_v3  ;;  %v1514_v7 = vld [vmem:[%s2415_s9] sm:$0xff]   ;;  %v1515_v8 = vld [vmem:[%s2422_s16] sm:$0xff]  }
 0x123   : > { %1310 = vmatpush3.bf16.msra.mxu1 %v1511_v4  ;;  %1303 = vmatprep.subr.bf16.mxu0 %v1951_v3  ;;  %v661_v20 = vld [vmem:[#allocation3] sm:$0xff]  ;;  %v2505_v21 = vld [vmem:[#allocation4] sm:$0xff]  ;;  %v662_v26 = vld [vmem:[#allocation3 + $0x8] sm:$0xff]  ;;  %v634_v49 = vand.u32 127, %v633_v42 }
 0x124   : > { %1311 = vmatprep.subr.bf16.mxu1 %v1951_v3  ;;  %1313 = vmatprep.mubr.msk.bf16.mxu1 %vm1952_vm1, %v1951_v3  ;;  %v2513_v28 = vld [vmem:[#allocation4 + $0x8] sm:$0xff]  ;;  %v638_v36 = vld [vmem:[%s2441_s13] sm:$0xff] }
 0x125   : > { %1509 = vset.pattern.permute.xlu1 %v1953_v19  ;;  %1508 = vset.pattern.permute.xlu0 %v1953_v19  ;;  %v639_v37 = vld [vmem:[%s2441_s13 + $0x8] sm:$0xff] }
 0x126   : > { %1304 = vmatpush3.bf16.msra.mxu0 %v1512_v5  ;;  %v640_v19 = vld [vmem:[#allocation9] sm:$0xff] }
 0x127   : > { %1312 = vmatpush3.bf16.msra.mxu1 %v1513_v6  ;;  %s1270_s9 = sshll.u32 %s2826_s6, 7  ;;  %p862_p0 = scmp.eq.s32.totalorder %s2826_s6, 1 }
 0x128   : > { %v636_v50 = vstv %s1270_s9  ;;  %p1275_p1 = scmp.ne.s32.totalorder %s2826_s6, 1 }
 0x129   : > { %1306 = vmatmul.mubr.msk.bf16.vlgmr.msra.gmra.mrb[0].mxu0 %vm586_vm2, %v1514_v7  ;;  %v637_v56 = vadd.s32 %v636_v50, %v634_v49  ;;  %s916_s23 = sld [smem:[#allocation2]] (!%p1275_p1)  ;;  %s1276_s5 = sld [smem:[#allocation2 + $0x1]] (!%p1275_p1) }
 0x12a   : > { %1314 = vmatmul.mubr.msk.bf16.vlgmr.msra.gmra.mrb[0].mxu1 %vm586_vm2, %v1515_v8  ;;  %s1277_s16 = sld [smem:[#allocation2 + $0x2]] (!%p1275_p1) }
 0x1fc   : > { %v2485_v9 = vpop.f32.mrb[0].mxu0 }
 0x1fd   : > { %631 = vst [vmem:[%s2458_s12] sm:$0xff] %v2485_v9  ;;  %v2489_v10 = vpop.f32.mrb[0].mxu1  ;;  %663 = vmax.xlane.f32.xlu1 %v2485_v9  ;;  %v1307_v11 = vpop.f32.mrb[1].mxu0 }
 0x1fe   : > { %v846_v12 = vsub.f32 %v2489_v10, %v2485_v9  ;;  %798 = vmax.xlane.f32.xlu0 %v2489_v10  ;;  %v1315_v13 = vpop.f32.mrb[1].mxu1  ;;  %v2495_v14 = vpop.f32.mrb[2].mxu0 }
 0x1ff   : > { %632 = vst [vmem:[%s2458_s12 + $0x8] sm:$0xff] %v2495_v14  ;;  %v2499_v15 = vpop.f32.mrb[2].mxu1  ;;  %v1308_v16 = vpop.f32.mrb[3].mxu0 }
 0x200   : > { %v847_v17 = vsub.f32 %v2499_v15, %v2495_v14  ;;  %v1316_v18 = vpop.f32.mrb[3].mxu1  ;;  %v848_v63 = vmul.f32 0.5, %v846_v12 }
 0x201   : > { %665 = vmax.xlane.f32.xlu1 %v2495_v14 }
 0x202   : > { %800 = vmax.xlane.f32.xlu0 %v2499_v15  ;;  %v849_v4 = vmul.f32 0.5, %v847_v17 }
 0x28a   : > { %v664_v22 = vpop.xlane.xlu1 %663 }
 0x28b   : > { %v799_v23 = vpop.xlane.xlu0 %798  ;;  %v667_v24 = vmax.f32 %v661_v20, %v664_v22 }
 0x28c   : > { %v2508_v25 = vmax.f32 %v2505_v21, %v799_v23  ;;  %v691_v23 = vld [vmem:[#allocation7] sm:$0xff] }
 0x28d   : > { %v2510_v27 = vsub.f32 %v661_v20, %v667_v24  ;;  %727 = vst.msk [vmem:[#allocation3] sm:$0xff] %vm658_vm3, %v667_v24  ;;  %671 = vperm.xlu1 %1509, %v667_v24  }
 0x28e   : > { %v822_v29 = vsub.f32 %v2505_v21, %v2508_v25  ;;  %860 = vst.msk [vmem:[#allocation4] sm:$0xff] %vm658_vm3, %v2508_v25  ;;  %806 = vperm.xlu0 %1508, %v2508_v25   ;;  %v666_v30 = vpop.xlane.xlu1 %665  ;;  %v641_v25 = vld [vmem:[#allocation9 + $0x8] sm:$0xff] }
 0x28f   : > { %v801_v31 = vpop.xlane.xlu0 %800  ;;  %v668_v32 = vmax.f32 %v662_v26, %v666_v30  ;;  %v711_v11 = vmul.f32 0.5, %v2510_v27 }
 0x290   : > { %v2521_v33 = vmax.f32 %v2513_v28, %v801_v31  ;;  %v824_v12 = vmul.f32 0.5, %v822_v29 }
 0x291   : > { %v2523_v34 = vsub.f32 %v662_v26, %v668_v32  ;;  %728 = vst.msk [vmem:[#allocation3 + $0x8] sm:$0xff] %vm658_vm3, %v668_v32  ;;  %v713_v13 = vmul.f32 1.442695, %v711_v11 }
 0x292   : > { %v823_v35 = vsub.f32 %v2513_v28, %v2521_v33  ;;  %861 = vst.msk [vmem:[#allocation4 + $0x8] sm:$0xff] %vm658_vm3, %v2521_v33  ;;  %811 = vperm.xlu1 %1509, %v2521_v33   ;;  %v826_v16 = vmul.f32 1.442695, %v824_v12  ;;  %v709_v28 = vld [vmem:[#allocation6] sm:$0xff] }
 0x294   : > { %v825_v17 = vmul.f32 0.5, %v823_v35  ;;  %v874_v11 = vld [vmem:[#allocation3] sm:$0xff] (!%p1275_p1) }
 0x296   : > { %676 = vperm.xlu1 %1509, %v668_v32   ;;  %v828_v20 = vmul.f32 1.442695, %v825_v17 }
 0x298   : > { %v875_v12 = vld [vmem:[#allocation3 + $0x8] sm:$0xff] (!%p1275_p1) }
 0x29a   : > { %643 = vperm.xlu1 %1509, %v638_v36  }
 0x29e   : > { %646 = vperm.xlu1 %1509, %v639_v37  }
 0x30c   : > { %v672_v38 = vpop.permute.xlu1 %671 }
 0x30d   : > { %v807_v39 = vpop.permute.xlu0 %806  ;;  %v679_v40 = vsub.f32 %v2485_v9, %v672_v38 }
 0x30e   : > { %v814_v41 = vsub.f32 %v2489_v10, %v807_v39  ;;  %v695_v10 = vmul.f32 1.442695, %v2510_v27  ;;  %v830_v39 = vld [vmem:[#allocation5] sm:$0xff] }
 0x30f   : > { %v681_v44 = vmul.f32 1.442695, %v679_v40  ;;  %v685_v45 = vmul.f32 0.5, %v679_v40 }
 0x310   : > { %v816_v43 = vmul.f32 0.5, %v814_v41 }
 0x311   : > { %v812_v46 = vpop.permute.xlu1 %811  ;;  %v687_v52 = vmul.f32 1.442695, %v685_v45 }
 0x312   : > { %v818_v47 = vmul.f32 1.442695, %v816_v43  ;;  %v815_v48 = vsub.f32 %v2499_v15, %v812_v46  ;;  %v712_v15 = vmul.f32 0.5, %v2523_v34  ;;  %v710_v43 = vld [vmem:[#allocation6 + $0x8] sm:$0xff] }
 0x314   : > { %1516 = vpow2.f32 %v818_v47  ;;  %v817_v51 = vmul.f32 0.5, %v815_v48  ;;  %v715_v18 = vmul.f32 1.442695, %v712_v15  ;;  %v842_v48 = vld [vmem:[#allocation8] sm:$0xff] }
 0x315   : > { %1518 = vpow2.f32 %v681_v44  ;;  %v677_v53 = vpop.permute.xlu1 %676  ;;  %v888_v15 = vld [vmem:[#allocation4] sm:$0xff] (!%p1275_p1) }
 0x316   : > { %v820_v54 = vmul.f32 1.442695, %v817_v51  ;;  %v680_v55 = vsub.f32 %v2495_v14, %v677_v53 }
 0x318   : > { %1520 = vpow2.f32 %v820_v54  ;;  %v683_v57 = vmul.f32 1.442695, %v680_v55  ;;  %v686_v58 = vmul.f32 0.5, %v680_v55 }
 0x319   : > { %1522 = vpow2.f32 %v687_v52  ;;  %v644_v59 = vpop.permute.xlu1 %643  ;;  %v831_v52 = vld [vmem:[#allocation5 + $0x8] sm:$0xff] }
 0x31a   : > { %1524 = vpow2.f32 %v683_v57  ;;  %v689_v60 = vmul.f32 1.442695, %v686_v58  ;;  %vm648_vm4 = vcmp.eq.s32.totalorder %v637_v56, %v644_v59  ;;  %v843_v59 = vld [vmem:[#allocation8 + $0x8] sm:$0xff] }
 0x31b   : > { %v650_v61 = vsel %vm648_vm4, %v2485_v9, 0.0 }
 0x31c   : > { %652 = vadd.xlane.f32.xlu1 %v650_v61  ;;  %1526 = vpow2.f32 %v689_v60 }
 0x31d   : > { %v647_v62 = vpop.permute.xlu1 %646  ;;  %1528 = vpow2.f32 %v695_v10 }
 0x31e   : > { %v1517_v0 = vpop.eup %1516  ;;  %vm649_vm5 = vcmp.eq.s32.totalorder %v637_v56, %v647_v62  ;;  %1530 = vpow2.f32 %v713_v13 }
 0x31f   : > { %v1519_v1 = vpop.eup %1518  ;;  %v651_v2 = vsel %vm649_vm5, %v2495_v14, 0.0  ;;  %v850_v3 = vmul.f32 %v1517_v0, %v848_v63  ;;  %v697_v14 = vmul.f32 1.442695, %v2523_v34  ;;  %v692_v34 = vld [vmem:[#allocation7 + $0x8] sm:$0xff] }
 0x320   : > { %701 = vadd.xlane.f32.xlu1 %v1519_v1  ;;  %654 = vadd.xlane.f32.xlu0 %v651_v2  ;;  %v2572_v1 = vld [vmem:[%s2447_s25 + $0x8] sm:$0xff] (!%p1275_p1) }
 0x321   : > { %1532 = vpow2.f32 %v697_v14 }
 0x322   : > { %v1521_v5 = vpop.eup %1520  ;;  %1534 = vpow2.f32 %v826_v16 }
 0x323   : > { %v1523_v6 = vpop.eup %1522  ;;  %v851_v7 = vmul.f32 %v1521_v5, %v849_v4  ;;  %1536 = vpow2.f32 %v715_v18  ;;  %v950_v4 = vsel (!%p1275_p1), %vm658_vm3, %v2572_v1, 0.0  ;;  %v876_v18 = vmul.f32 (!%p1275_p1), 0.5, %v874_v11 }
 0x324   : > { %v1525_v8 = vpop.eup %1524  ;;  %719 = vadd.xlane.f32.xlu0 %v1523_v6  ;;  %1538 = vpow2.f32 %v828_v20 }
 0x325   : > { %703 = vadd.xlane.f32.xlu1 %v1525_v8 }
 0x326   : > { %v1527_v9 = vpop.eup %1526 }
 0x327   : > { %v1529_v21 = vpop.eup %1528 }
 0x328   : > { %834 = vadd.xlane.f32.xlu0 %v1517_v0  ;;  %v699_v26 = vmul.f32 %v1529_v21, %v691_v23  ;;  %v1531_v27 = vpop.eup %1530  ;;  %v2569_v0 = vld [vmem:[%s2447_s25] sm:$0xff] (!%p1275_p1)  ;;  %v877_v21 = vmul.f32 (!%p1275_p1), 0.5, %v875_v12 }
 0x329   : > { %721 = vadd.xlane.f32.xlu1 %v1527_v9  ;;  %v717_v35 = vmul.f32 %v1531_v27, %v709_v28 }
 0x32b   : > { %v1533_v31 = vpop.eup %1532 }
 0x32c   : > { %852 = vadd.xlane.f32.xlu0 %v850_v3  ;;  %v1535_v36 = vpop.eup %1534  ;;  %v700_v38 = vmul.f32 %v1533_v31, %v692_v34  ;;  %v949_v3 = vsel (!%p1275_p1), %vm658_vm3, %v2569_v0, 0.0 }
 0x32d   : > { %836 = vadd.xlane.f32.xlu1 %v1521_v5  ;;  %v1537_v40 = vpop.eup %1536  ;;  %v832_v45 = vmul.f32 %v1535_v36, %v830_v39  ;;  %v844_v54 = vmul.f32 %v1535_v36, %v842_v48  ;;  %v951_v6 = vadd.f32 (!%p1275_p1), %v950_v4, %v949_v3 }
 0x32e   : > { %v718_v47 = vmul.f32 %v1537_v40, %v710_v43  ;;  %v1539_v49 = vpop.eup %1538 }
 0x32f   : > { %v833_v56 = vmul.f32 %v1539_v49, %v831_v52  ;;  %v845_v61 = vmul.f32 %v1539_v49, %v843_v59 }
 0x331   : > { %854 = vadd.xlane.f32.xlu1 %v851_v7 }
 0x335   : > { %952 = vadd.xlane.f32.xlu1 (!%p1275_p1), %v951_v6 }
 0x3a9   : > { %v653_v22 = vpop.xlane.xlu1 %652 }
 0x3aa   : > { %v656_v24 = vadd.f32 %v653_v22, %v640_v19  ;;  %v889_v19 = vld [vmem:[#allocation4 + $0x8] sm:$0xff] (!%p1275_p1) }
 0x3ac   : > { %659 = vst.msk [vmem:[#allocation9] sm:$0xff] %vm658_vm3, %v656_v24 }
 0x3ad   : > { %v655_v29 = vpop.xlane.xlu0 %654  ;;  %v702_v30 = vpop.xlane.xlu1 %701 }
 0x3ae   : > { %v657_v32 = vadd.f32 %v655_v29, %v641_v25  ;;  %v705_v33 = vadd.f32 %v702_v30, %v699_v26  ;;  %v890_v25 = vmul.f32 (!%p1275_p1), 0.5, %v888_v15  ;;  %v891_v30 = vmul.f32 (!%p1275_p1), 0.5, %v889_v19 }
 0x3b0   : > { %660 = vst.msk [vmem:[#allocation9 + $0x8] sm:$0xff] %vm658_vm3, %v657_v32  ;;  %707 = vst.msk [vmem:[#allocation7] sm:$0xff] %vm658_vm3, %v705_v33 }
 0x3b1   : > { %v720_v37 = vpop.xlane.xlu0 %719 }
 0x3b2   : > { %v723_v41 = vadd.f32 %v720_v37, %v717_v35  ;;  %v704_v42 = vpop.xlane.xlu1 %703 }
 0x3b3   : > { %v706_v44 = vadd.f32 %v704_v42, %v700_v38  ;;  %v910_v43 = vld [vmem:[#allocation9] sm:$0xff] (!%p1275_p1) }
 0x3b4   : > { %725 = vst.msk [vmem:[#allocation6] sm:$0xff] %vm658_vm3, %v723_v41 }
 0x3b5   : > { %708 = vst.msk [vmem:[#allocation7 + $0x8] sm:$0xff] %vm658_vm3, %v706_v44  ;;  %v835_v46 = vpop.xlane.xlu0 %834 }
 0x3b6   : > { %v838_v50 = vadd.f32 %v835_v46, %v832_v45  ;;  %v722_v51 = vpop.xlane.xlu1 %721 }
 0x3b7   : > { %v724_v53 = vadd.f32 %v722_v51, %v718_v47  ;;  %v900_v9 = vld [vmem:[#allocation7] sm:$0xff] (!%p1275_p1)  ;;  %v911_v46 = vld [vmem:[#allocation9 + $0x8] sm:$0xff] (!%p1275_p1) }
 0x3b8   : > { %840 = vst.msk [vmem:[#allocation5] sm:$0xff] %vm658_vm3, %v838_v50 }
 0x3b9   : > { %726 = vst.msk [vmem:[#allocation6 + $0x8] sm:$0xff] %vm658_vm3, %v724_v53  ;;  %v853_v55 = vpop.xlane.xlu0 %852 }
 0x3ba   : > { %v856_v57 = vadd.f32 %v853_v55, %v844_v54  ;;  %v837_v58 = vpop.xlane.xlu1 %836 }
 0x3bb   : > { %v839_v60 = vadd.f32 %v837_v58, %v833_v56  ;;  %865 = sbr.rel (%p1275_p1) target bundleno = 1201 (0x4b1), region = 80  ;;  %v878_v7 = vld [vmem:[#allocation6] sm:$0xff] (!%p1275_p1) }
 0x3bc   : > { %858 = vst.msk [vmem:[#allocation8] sm:$0xff] %vm658_vm3, %v856_v57  ;;  %v901_v10 = vld [vmem:[#allocation7 + $0x8] sm:$0xff] (!%p1275_p1) }
 0x3bd   : > { %841 = vst.msk [vmem:[#allocation5 + $0x8] sm:$0xff] %vm658_vm3, %v839_v60 }
 0x3be   : > { %v855_v62 = vpop.xlane.xlu1 %854 }
 0x3bf   : > { %v857_v63 = vadd.f32 %v855_v62, %v845_v61  ;;  %v866_v2 = vld [vmem:[#allocation5] sm:$0xff] (!%p1275_p1) }
 0x3c0   : > { %1540 = vrcp.f32 (!%p1275_p1), %v866_v2  ;;  %v879_v8 = vld [vmem:[#allocation6 + $0x8] sm:$0xff] (!%p1275_p1) }
 0x3c1   : > { %859 = vst.msk [vmem:[#allocation8 + $0x8] sm:$0xff] %vm658_vm3, %v857_v63 }
 0x3c2   : > { %v953_v59 = vpop.xlane.xlu1 %952 }
 0x3c3   : > { %v868_v14 = vld [vmem:[#allocation8] sm:$0xff]  ;;  %v954_v60 = vrot.slane %v953_v59, 4 }
 0x3c4   : > { %v867_v5 = vld [vmem:[#allocation5 + $0x8] sm:$0xff] }
 0x3c5   : > { %1542 = vrcp.f32 %v867_v5  ;;  %v955_v61 = vadd.f32 %v954_v60, %v953_v59 }
 0x3c6   : > { %1544 = vlog2.f32 %v878_v7 }
 0x3c7   : > { %1546 = vlog2.f32 %v879_v8  ;;  %v956_v3 = vrot.slane %v955_v61, 2 }
 0x3c8   : > { %1548 = vlog2.f32 %v866_v2  ;;  %v869_v17 = vld [vmem:[#allocation8 + $0x8] sm:$0xff] }
 0x3c9   : > { %1550 = vlog2.f32 %v867_v5 }
 0x3ca   : > { %1552 = vlog2.f32 %v900_v9  ;;  %v1541_v13 = vpop.eup %1540 }
 0x3cb   : > { %1554 = vlog2.f32 %v901_v10  ;;  %v871_v23 = vmul.f32 %v1541_v13, %v868_v14 }
 0x3cf   : > { %v1543_v16 = vpop.eup %1542 }
 0x3d0   : > { %v1545_v20 = vpop.eup %1544  ;;  %v873_v27 = vmul.f32 %v1543_v16, %v869_v17 }
 0x3d1   : > { %v1547_v22 = vpop.eup %1546  ;;  %v881_v24 = vmul.f32 0.6931472, %v1545_v20 }
 0x3d2   : > { %v1549_v26 = vpop.eup %1548  ;;  %v883_v29 = vmul.f32 0.6931472, %v1547_v22 }
 0x3d3   : > { %v1551_v28 = vpop.eup %1550  ;;  %v884_v31 = vadd.f32 %v881_v24, %v876_v18  ;;  %v893_v32 = vmul.f32 0.6931472, %v1549_v26 }
 0x3d4   : > { %v1553_v33 = vpop.eup %1552  ;;  %v885_v34 = vadd.f32 %v883_v29, %v877_v21  ;;  %v895_v35 = vmul.f32 0.6931472, %v1551_v28 }
 0x3d5   : > { %v1555_v36 = vpop.eup %1554  ;;  %v886_v37 = vadd.f32 %v884_v31, %v871_v23  ;;  %v896_v38 = vadd.f32 %v893_v32, %v890_v25  ;;  %v903_v39 = vmul.f32 0.6931472, %v1553_v33 }
 0x3d6   : > { %v887_v40 = vadd.f32 %v885_v34, %v873_v27  ;;  %v897_v41 = vadd.f32 %v895_v35, %v891_v30  ;;  %v905_v42 = vmul.f32 0.6931472, %v1555_v36 }
 0x3d7   : > { %v898_v44 = vsub.f32 %v886_v37, %v896_v38  ;;  %v906_v45 = vadd.f32 %v903_v39, %v874_v11 }
 0x3d8   : > { %v899_v47 = vsub.f32 %v887_v40, %v897_v41  ;;  %v907_v48 = vadd.f32 %v905_v42, %v875_v12 }
 0x3d9   : > { %v917_v49 = vsel %vm658_vm3, %v898_v44, 0.0  ;;  %v912_v50 = vsub.f32 %v906_v45, %v910_v43 }
 0x3da   : > { %v918_v51 = vsel %vm658_vm3, %v899_v47, 0.0  ;;  %v913_v52 = vsub.f32 %v907_v48, %v911_v46 }
 0x3db   : > { %v919_v53 = vadd.f32 %v918_v51, %v917_v49  ;;  %v914_v54 = vmul.f32 %v912_v50, %v2569_v0 }
 0x3dc   : > { %v915_v55 = vmul.f32 %v913_v52, %v2572_v1  ;;  %v957_v1 = vadd.f32 %v956_v3, %v955_v61 }
 0x3dd   : > { %920 = vadd.xlane.f32.xlu0 %v919_v53  ;;  %v933_v56 = vsel %vm658_vm3, %v914_v54, 0.0 }
 0x3de   : > { %v934_v57 = vsel %vm658_vm3, %v915_v55, 0.0  ;;  %v958_v12 = vrot.slane %v957_v1, 1 }
 0x3df   : > { %v935_v58 = vadd.f32 %v934_v57, %v933_v56 }
 0x3e0   : > { %v959_v15 = vadd.f32 %v958_v12, %v957_v1 }
 0x3e1   : > { %936 = vadd.xlane.f32.xlu0 %v935_v58 }
 0x46a   : > { %v921_v62 = vpop.xlane.xlu0 %920 }
 0x46b   : > { %v922_v63 = vrot.slane %v921_v62, 4 }
 0x46d   : > { %v923_v2 = vadd.f32 %v922_v63, %v921_v62 }
 0x46e   : > { %v937_v4 = vpop.xlane.xlu0 %936 }
 0x46f   : > { %v924_v5 = vrot.slane %v923_v2, 2  ;;  %v938_v6 = vrot.slane %v937_v4, 4 }
 0x471   : > { %v939_v0 = vadd.f32 %v938_v6, %v937_v4  ;;  %v925_v7 = vadd.f32 %v924_v5, %v923_v2 }
 0x473   : > { %v940_v8 = vrot.slane %v939_v0, 2  ;;  %v926_v9 = vrot.slane %v925_v7, 1 }
 0x475   : > { %v941_v10 = vadd.f32 %v940_v8, %v939_v0  ;;  %v927_v11 = vadd.f32 %v926_v9, %v925_v7 }
 0x477   : > { %1317 = vpush %v927_v11  ;;  %v942_v13 = vrot.slane %v941_v10, 1 }
 0x479   : > { %v943_v14 = vadd.f32 %v942_v13, %v941_v10 }
 0x47b   : > { %1319 = vpush %v943_v14 }
 0x47c   : > { %1321 = vpush %v959_v15 }
 0x4a8   : > { %s1318_s21 = spop %1317 }
 0x4a9   : > { %s929_s14 = sadd.f32 %s1318_s21, %s916_s23 }
 0x4ab   : > { %931 = sst [smem:[#allocation2]] %s929_s14 }
 0x4ac   : > { %s1320_s8 = spop %1319 }
 0x4ad   : > { %s945_s7 = sadd.f32 %s1320_s8, %s1276_s5  ;;  %s1322_s20 = spop %1321 }
 0x4ae   : > { %s961_s15 = sadd.f32 %s1322_s20, %s1277_s16 }
 0x4af   : > { %947 = sst [smem:[#allocation2 + $0x1]] %s945_s7 }
 0x4b0   : > { %963 = sst [smem:[#allocation2 + $0x2]] %s961_s15 }
 0x4b1 PF: > { %s2827_s30 = sld [smem:[#allocation41_spill]] }
 0x4b7   : > { %p964_p8 = scmp.eq.s32.totalorder %s2827_s30, 1 }
 0x4b9   : > { %p965_p4 = pnand %p964_p8, %p862_p0 }
 0x4ba   : > { %s969_s13 = sld [smem:[#allocation2]] (!%p965_p4)  ;;  %s1279_s11 = sld [smem:[#allocation2 + $0x2]] (!%p965_p4) }
 0x4bb   : > { %968 = sbr.rel (%p965_p4) target bundleno = 1282 (0x502), region = 84  ;;  %s1954_s22 = smov (!%p965_p4), 1.0  }
 0x4bc   : > { %s1278_s26 = sld [smem:[#allocation2 + $0x1]] (!%p965_p4) }
 0x4c0   : > { %s970_s25 = smul.f32 (!%p965_p4), 4.0, %s969_s13  ;;  %s976_s29 = smax.f32 (!%p965_p4), %s1954_s22, %s1279_s11 }
 0x4c1   : > { %v977_v16 = vstv (!%p965_p4), %s976_s29 }
 0x4c2   : > { %s971_s24 = smul.f32 0.5, %s970_s25  ;;  %1556 = vrcp.f32 %v977_v16 }
 0x4c4   : > { %973 = sst [smem:[#allocation23]] %s971_s24 }
 0x4cc   : > { %v1557_v17 = vpop.eup %1556 }
 0x4cd   : > { %1323 = vpush %v1557_v17 }
 0x4fe   : > { %s1324_s6 = spop %1323 }
 0x4ff   : > { %s980_s9 = smul.f32 %s1324_s6, %s1278_s26 }
 0x501   : > { %982 = sst [smem:[#allocation24]] %s980_s9 }
 0x502 PF: > { %s2829_s23 = sld [smem:[#allocation41_spill]]  ;;  %s2830_s5 = sld [smem:[#allocation40_spill]] }
 0x503   : > { %s2831_s16 = sld [smem:[#allocation50_spill]]  ;;  %s999_s8 = sshll.u32 %s2458_s12, 4  ;;  %s2590_s8 = int_to_ptr.vmem [resolvable:$true] %s999_s8 }
 0x504   : > { %s2832_s30 = sld [smem:[#allocation56_spill]]  ;;  %s2599_s13 = scalar_lea.sflag [#allocation12], %s520_s1 }
 0x505   : > { %s1738_s11 = scalar_lea.vmem %s2590_s8, 256  ;;  %s1955_s12 = smov [#allocation22]  }
 0x506   : > { %p1739_p6 = scmp.ne.s32.totalorder %s2590_s8, %s1738_s11  ;;  %s1742_s22 = sshll.u32 %s1955_s12, 4  ;;  %s1743_s22 = int_to_ptr.vmem [resolvable:$false] %s1742_s22 }
 0x507   : > { %s1744_s29 = scalar_lea.vmem %s1743_s22, 512  ;;  %p1745_p12 = scmp.lt.s32.totalorder %s2590_s8, %s1743_s22 }
 0x508   : > { %s1294_s21 = sshll.u32 %s2829_s23, 2  ;;  %p1746_p7 = scmp.lt.s32.totalorder %s1744_s29, %s1738_s11 }
 0x509   : > { %s996_s14 = sadd.s32 %s2830_s5, %s1294_s21  ;;  %p2834_p13 = scmp.ne.s32.totalorder %s2831_s16, 0 }
 0x50a   : > { %s1283_s7 = sshll.u32 %s996_s14, 7  ;;  %s2833_s25 = smov %s2832_s30 }
 0x50b   : > { %s2595_s10 = scalar_lea.hbm %s2832_s30, %s1283_s7  ;;  %p1740_p3 = pnand %p1739_p6, %p2834_p13 }
 0x50c   : > { %p1747_p5 = por %p1746_p7, %p1745_p12 }
 0x50d   : > { %p1741_p10 = pneg %p1740_p3 }
 0x50f   : > { %p1748_p2 = pnand %p1747_p5, %p1741_p10 }
 0x511   : > { %1751 = shalt.err (!%p1748_p2)
}
 0x512   : > { %s1752_s1 = scalar_lea.hbm %s2595_s10, 256  ;;  %s1756_s6 = scalar_lea.hbm %s2833_s25, 1024 }
 0x513   : > { %p1753_p9 = scmp.ne.s32.totalorder %s2595_s10, %s1752_s1  ;;  %p1757_p1 = scmp.lt.u32.totalorder %s2595_s10, %s2833_s25 }
 0x514   : > { %p1758_p8 = scmp.lt.u32.totalorder %s1756_s6, %s1752_s1  ;;  %p1760_p6 = scmp.lt.u32.totalorder %s1752_s1, %s2595_s10 }
 0x515   : > { %p1754_p11 = pnand %p1753_p9, %p2834_p13 }
 0x516   : > { %p1759_p4 = por %p1758_p8, %p1757_p1 }
 0x517   : > { %p1755_p0 = pneg %p1754_p11 }
 0x518   : > { %p1761_p3 = por %p1760_p6, %p1759_p4 }
 0x51a   : > { %p1762_p10 = pnand %p1761_p3, %p1755_p0 }
 0x51c   : > { %1765 = shalt.err (!%p1762_p10)
}
 0x51d   : > { %s1956_s5 = smov 128   ;;  %s2835_s21 = sld [smem:[#allocation43_spill]] }
 0x51e   : > { %s1957_s14 = smov 256   ;;  %s1958_s7 = smov 8  }
 0x51f   : > { %1341 = dma.vmem_to_hbm [thread:$0]  (%p2834_p13), %s2590_s8, 256, %s2595_s10, %s2599_s13, %s1956_s5, %s1957_s14, %s1958_s7  }
 0x520   : > { %s2836_s30 = sld [smem:[#allocation57_spill]] }
 0x523   : > { %p2838_p7 = scmp.eq.s32.totalorder %s2835_s21, 3 }
 0x526   : > { %s2837_s22 = smov %s2836_s30  ;;  %s1766_s11 = scalar_lea.hbm %s2836_s30, 16 }
 0x527   : > { %p1767_p12 = scmp.ne.s32.totalorder %s2837_s22, %s1766_s11  ;;  %p1772_p9 = scmp.lt.u32.totalorder %s1766_s11, %s2837_s22 }
 0x529   : > { %p1768_p5 = pnand %p1767_p12, %p2838_p7 }
 0x52b   : > { %p1769_p2 = pneg %p1768_p5 }
 0x52d   : > { %p1774_p11 = pnand %p1772_p9, %p1769_p2 }
 0x52f   : > { %1777 = shalt.err (!%p1774_p11)
}
 0x530   : > { %s1959_s26 = smov [#allocation23]   ;;  %p2839_p13 = pmov %p2838_p7 }
 0x531   : > { %s2840_s6 = sld [smem:[#allocation58_spill]]  ;;  %p2841_p1 = pmov %p2838_p7 }
 0x532   : > { %1343 = dma.smem_to_hbm (%p2839_p13), %s1959_s26, 16, %s2837_s22, [#allocation13]  }
 0x537   : > { %s1778_s9 = scalar_lea.hbm %s2840_s6, 16 }
 0x538   : > { %p1779_p0 = scmp.ne.s32.totalorder %s2840_s6, %s1778_s9  ;;  %p1784_p6 = scmp.lt.u32.totalorder %s1778_s9, %s2840_s6 }
 0x53a   : > { %p1780_p8 = pnand %p1779_p0, %p2841_p1 }
 0x53c   : > { %p1781_p4 = pneg %p1780_p8 }
 0x53e   : > { %p1786_p3 = pnand %p1784_p6, %p1781_p4 }
 0x540   : > { %1789 = shalt.err (!%p1786_p3)
}
 0x541   : > { %s1960_s20 = smov [#allocation24]   ;;  %p2842_p10 = pmov %p2841_p1 }
 0x542   : > { %p2843_p12 = pmov %p2841_p1 }
 0x543   : > { %1345 = dma.smem_to_hbm (%p2842_p10), %s1960_s20, 16, %s2840_s6, [#allocation25]  }
 0x544   : > { %1871 = dma.done.wait (%p2843_p12), [#allocation13], 16   ;;  %p2844_p7 = pmov %p2841_p1 }
 0x545   : > { %p2845_p5 = pmov %p2841_p1 }
 0x546   : > { %1873 = vsyncadd (%p2844_p7), [#allocation13], 4294967280 }
 0x547   : > { %1875 = dma.done.wait (%p2845_p5), [#allocation25], 16   ;;  %p2846_p2 = pmov %p2841_p1 }
 0x549   : > { %1877 = vsyncadd (%p2846_p2), [#allocation25], 4294967280 }
 0x54a   : > { %1032 = sfence }
 0x54b PF: > { %p1379_p9 = scmp.ge.s32.totalorder %s1936_s18, 2  ;;  %s1041_s11 = sand.u32 1, %s1884_s27  }
 0x54c   : > { %p2847_p11 = scmp.ne.s32.totalorder %s2800_s19, 0  ;;  %s1042_s12 = scalar_lea.sflag [#allocation12], %s1041_s11 }
 0x54e   : > { %p1371_p13 = pnand %p1379_p9, %p2847_p11 }
 0x550   : > { %1879 = dma.done.wait (!%p1371_p13), %s1042_s12, 256  }
 0x551   : > { %1881 = vsyncadd (!%p1371_p13), %s1042_s12, 4294967040  ;;  %s36_s18 = sadd.s32 1, %s1936_s18   ;;  %s2849_s21 = sld [smem:[#allocation35_spill]] }
 0x552   : > { %p2668_p0 = scmp.ge.s32.totalorder %s36_s18, 6   ;;  %s2850_s1 = sld [smem:[#allocation52_spill]] }
 0x553   : > { %s2851_s30 = sld [smem:[#allocation36_spill]]  ;;  %s2852_s9 = sld [smem:[#allocation37_spill]] }
 0x554   : > { %s2853_s10 = sld [smem:[#allocation49_spill]]  ;;  %s2854_s11 = sld [smem:[#allocation38_spill]] }
 0x555   : > { %s2855_s12 = sld [smem:[#allocation39_spill]]  ;;  %s2856_s13 = sld [smem:[#allocation51_spill]] }
 0x556   : > { %s2857_s14 = sld [smem:[#allocation42_spill]]  ;;  %s2858_s16 = sld [smem:[#allocation46_spill]] }
 0x557   : > { %s2859_s19 = sld [smem:[#allocation48_spill]]  ;;  %s2861_s27 = smov %s1888_s28 }
 0x558   : > { %s2862_s28 = smov %s2849_s21  ;;  %s2863_s29 = smov %s2850_s1 }
 0x559   : > { %s2864_s15 = smov %s1932_s17  ;;  %35 = sbr.rel (!%p2668_p0) target bundleno = 25 (0x19), region = 191 }
 0x55d   : > { %s2865_s17 = smov %s2859_s19 }
 0x560   :  { %1047 = vsyncpa [#allocation11], 1 }
 0x561   :  { %1049 = vsyncpa [#allocation11 + $0x1], 1 }
 0x562   :  { %1050 = vsyncpa [#allocation15], 1 }
 0x563   :  { %1052 = vsyncpa [#allocation15 + $0x1], 1 }
 0x564   :  { %1053 = vsyncpa [#allocation18], 1 }
 0x565   :  { %1055 = vsyncpa [#allocation18 + $0x1], 1 }
 0x566   :  { %1056 = vsyncpa [#allocation21], 1 }
 0x567   :  { %1058 = vsyncpa [#allocation21 + $0x1], 1 }
 0x568   :  { %1059 = vsyncpa [#allocation12], 1 }
 0x569   :  { %1061 = vsyncpa [#allocation12 + $0x1], 1 }
 0x56a   :  { %1062 = vsyncpa [#allocation13], 1 }
 0x56b   :  { %1064 = vsyncpa [#allocation13 + $0x1], 1 }
 0x56c   :  { %1065 = vsyncpa [#allocation25], 1 }

</bundles_post_ra>
